<compile_context>
chip_gen: v7x
topology: tpu7x:2x2x1
jax: 0.10.0
libtpu: 0.0.40
codegen_flags: <defaults>
</compile_context>

<pallas_src>
import functools
import math

import jax
import jax.numpy as jnp
from jax.experimental import pallas as pl
from jax.experimental.pallas import tpu as pltpu


def _round_up(x, m):
    return ((x + m - 1) // m) * m


def _pick_tile(dim, target, align):
    """Largest multiple of `align` <= target that divides dim, else the full dim."""
    if dim <= target:
        return dim
    t = (target // align) * align
    while t >= align:
        if dim % t == 0:
            return t
        t -= align
    return dim


def _gelu_tanh(x):
    # TODO(synk): torch nn.GELU() default is exact (erf); tanh approximation is used so the
    # GELU can be fused into the matmul epilogue (EUP tanh); max abs deviation ~1e-3.
    c = 0.7978845608028654  # sqrt(2/pi)
    return 0.5 * x * (1.0 + jnp.tanh(c * (x + 0.044715 * x * x * x)))


# ----------------------------------------------------------------------------
# Generic tiled linear kernel body: y = x @ w [+ b] [-> act] [+ residual]
# (reduction axis is always grid axis 2; bf16 inputs, f32 accumulation)
# ----------------------------------------------------------------------------

def _make_linear_kernel(has_bias, has_residual, activation):
    def kernel(*refs):
        i = 0
        x_ref = refs[i]; i += 1
        w_ref = refs[i]; i += 1
        b_ref = None
        r_ref = None
        if has_bias:
            b_ref = refs[i]; i += 1
        if has_residual:
            r_ref = refs[i]; i += 1
        o_ref = refs[i]
        acc_ref = refs[i + 1]

        k = pl.program_id(2)

        @pl.when(k == 0)
        def _():
            acc_ref[...] = jnp.zeros_like(acc_ref)

        acc_ref[...] += jnp.dot(x_ref[...], w_ref[...],
                                preferred_element_type=jnp.float32)

        @pl.when(k == pl.num_programs(2) - 1)
        def _():
            y = acc_ref[...]
            if has_bias:
                y = y + b_ref[...]
            if activation == "gelu":
                y = _gelu_tanh(y)
            if has_residual:
                y = y + r_ref[...]
            o_ref[...] = y.astype(o_ref.dtype)

    return kernel


def pallas_linear(x, w, b=None, residual=None, *, out_dtype=jnp.bfloat16,
                  activation=None, tm_target=256, tn_target=512, tk_target=1024):
    """x (M,K) bf16, w (K,N) bf16, b (1,N) f32, residual (M,N) f32."""
    M, K = x.shape
    Kw, N = w.shape
    assert K == Kw
    tm = _pick_tile(M, tm_target, 8)
    tn = _pick_tile(N, tn_target, 128)
    tk = _pick_tile(K, tk_target, 128)

    has_bias = b is not None
    has_res = residual is not None
    operands = [x, w]
    in_specs = [
        pl.BlockSpec((tm, tk), lambda i, j, k: (i, k)),
        pl.BlockSpec((tk, tn), lambda i, j, k: (k, j)),
    ]
    if has_bias:
        operands.append(b)
        in_specs.append(pl.BlockSpec((1, tn), lambda i, j, k: (0, j)))
    if has_res:
        operands.append(residual)
        in_specs.append(pl.BlockSpec((tm, tn), lambda i, j, k: (i, j)))

    return pl.pallas_call(
        _make_linear_kernel(has_bias, has_res, activation),
        out_shape=jax.ShapeDtypeStruct((M, N), out_dtype),
        grid=(M // tm, N // tn, K // tk),
        in_specs=in_specs,
        out_specs=pl.BlockSpec((tm, tn), lambda i, j, k: (i, j)),
        scratch_shapes=[pltpu.VMEM((tm, tn), jnp.float32)],
        compiler_params=pltpu.CompilerParams(
            dimension_semantics=("parallel", "parallel", "arbitrary")),
    )(*operands)


def pallas_linear_headk(x_hmd, w_hdn, b=None, residual=None, *,
                        out_dtype=jnp.float32, tm_target=256, tn_target=512):
    """Split-K linear over heads: x (H, M, hd) bf16, w (H, hd, N) bf16 -> (M, N).

    Lets the attention-output projection consume the flash kernel's head-major
    output with no transpose (the K reduction axis is the head axis)."""
    H, M, hd = x_hmd.shape
    Hw, hdw, N = w_hdn.shape
    assert H == Hw and hd == hdw
    tm = _pick_tile(M, tm_target, 8)
    tn = _pick_tile(N, tn_target, 128)

    has_bias = b is not None
    has_res = residual is not None
    operands = [x_hmd, w_hdn]
    in_specs = [
        pl.BlockSpec((None, tm, hd), lambda i, j, h: (h, i, 0)),
        pl.BlockSpec((None, hd, tn), lambda i, j, h: (h, 0, j)),
    ]
    if has_bias:
        operands.append(b)
        in_specs.append(pl.BlockSpec((1, tn), lambda i, j, h: (0, j)))
    if has_res:
        operands.append(residual)
        in_specs.append(pl.BlockSpec((tm, tn), lambda i, j, h: (i, j)))

    return pl.pallas_call(
        _make_linear_kernel(has_bias, has_res, None),
        out_shape=jax.ShapeDtypeStruct((M, N), out_dtype),
        grid=(M // tm, N // tn, H),
        in_specs=in_specs,
        out_specs=pl.BlockSpec((tm, tn), lambda i, j, h: (i, j)),
        scratch_shapes=[pltpu.VMEM((tm, tn), jnp.float32)],
        compiler_params=pltpu.CompilerParams(
            dimension_semantics=("parallel", "parallel", "arbitrary")),
    )(*operands)


# ----------------------------------------------------------------------------
# QKV projection with fused RoPE epilogue, emitting head-major (3H, M, hd) output
# ----------------------------------------------------------------------------

def _qkv_kernel(x_ref, w_ref, b_ref, cos_ref, sin_ref, rot_ref, o_ref, acc_ref, *,
                n_head):
    j = pl.program_id(1)          # which hd-wide output block: [0,H)=q, [H,2H)=k, [2H,3H)=v
    k = pl.program_id(2)          # reduction over K blocks
    last = pl.num_programs(2) - 1

    @pl.when(k == 0)
    def _():
        acc_ref[...] = jnp.zeros_like(acc_ref)

    acc_ref[...] += jnp.dot(x_ref[...], w_ref[...],
                            preferred_element_type=jnp.float32)

    @pl.when((k == last) & (j < 2 * n_head))
    def _():
        # q / k head: add bias then apply RoPE.  rotate_half(y) == y @ R with the
        # constant +-1 pair-swap matrix R (tiny MXU matmul, no cross-lane shuffles).
        y = acc_ref[...] + b_ref[...]
        rh = jnp.dot(y.astype(jnp.bfloat16), rot_ref[...],
                     preferred_element_type=jnp.float32)
        o_ref[...] = (y * cos_ref[...] + rh * sin_ref[...]).astype(o_ref.dtype)

    @pl.when((k == last) & (j >= 2 * n_head))
    def _():
        # v head: no RoPE.
        o_ref[...] = (acc_ref[...] + b_ref[...]).astype(o_ref.dtype)


def pallas_qkv_proj(x, w_qkv, b_qkv, cos_rows, sin_rows, rot, *, n_head,
                    tm_target=256, tk_target=1024):
    """x (M,C) bf16, w_qkv (3H,C,hd) bf16, b_qkv (3H,1,hd) f32 -> (3H, M, hd) bf16."""
    M, K = x.shape
    nH3, Kw, hd = w_qkv.shape
    assert K == Kw and nH3 == 3 * n_head
    tm = _pick_tile(M, tm_target, 8)
    tk = _pick_tile(K, tk_target, 128)

    return pl.pallas_call(
        functools.partial(_qkv_kernel, n_head=n_head),
        out_shape=jax.ShapeDtypeStruct((nH3, M, hd), jnp.bfloat16),
        grid=(M // tm, nH3, K // tk),
        in_specs=[
            pl.BlockSpec((tm, tk), lambda i, j, k: (i, k)),          # x
            pl.BlockSpec((None, tk, hd), lambda i, j, k: (j, k, 0)),  # w
            pl.BlockSpec((None, 1, hd), lambda i, j, k: (j, 0, 0)),   # bias
            pl.BlockSpec((tm, hd), lambda i, j, k: (i, 0)),           # cos (per row)
            pl.BlockSpec((tm, hd), lambda i, j, k: (i, 0)),           # sin (per row)
            pl.BlockSpec((hd, hd), lambda i, j, k: (0, 0)),           # rotate_half matrix
        ],
        out_specs=pl.BlockSpec((None, tm, hd), lambda i, j, k: (j, i, 0)),
        scratch_shapes=[pltpu.VMEM((tm, hd), jnp.float32)],
        compiler_params=pltpu.CompilerParams(
            dimension_semantics=("parallel", "parallel", "arbitrary")),
    )(x, w_qkv, b_qkv, cos_rows, sin_rows, rot)


# ----------------------------------------------------------------------------
# Row-tiled LayerNorm (eps = 1e-5, matches torch default), bf16 output
# ----------------------------------------------------------------------------

def _layernorm_kernel(x_ref, g_ref, b_ref, o_ref):
    x = x_ref[...]
    mu = jnp.mean(x, axis=-1, keepdims=True)
    var = jnp.mean(jnp.square(x - mu), axis=-1, keepdims=True)
    y = (x - mu) * jax.lax.rsqrt(var + 1e-5) * g_ref[...] + b_ref[...]
    o_ref[...] = y.astype(o_ref.dtype)


def pallas_layernorm(x, gamma, beta, *, out_dtype=jnp.bfloat16):
    M, C = x.shape
    # Scale the row tile inversely with C so the (in + out) tiles stay a few MiB
    # (v7x: 64 MiB VMEM total / 32 MiB scoped).
    target = max(8, min(256, ((1 << 21) // (4 * C)) // 8 * 8))
    tm = _pick_tile(M, target, 8)
    return pl.pallas_call(
        _layernorm_kernel,
        out_shape=jax.ShapeDtypeStruct((M, C), out_dtype),
        grid=(M // tm,),
        in_specs=[
            pl.BlockSpec((tm, C), lambda i: (i, 0)),
            pl.BlockSpec((1, C), lambda i: (0, 0)),
            pl.BlockSpec((1, C), lambda i: (0, 0)),
        ],
        out_specs=pl.BlockSpec((tm, C), lambda i: (i, 0)),
        compiler_params=pltpu.CompilerParams(dimension_semantics=("parallel",)),
    )(x, gamma, beta)


# ----------------------------------------------------------------------------
# Flash-style causal attention over the head-major qkv buffer
# ----------------------------------------------------------------------------

def _flash_attn_kernel(q_ref, k_ref, v_ref, o_ref, m_scr, l_scr, acc_scr, *,
                       scale, tq, tkv):
    qi = pl.program_id(2)
    ki = pl.program_id(3)

    @pl.when(ki == 0)
    def _():
        m_scr[...] = jnp.full_like(m_scr, -jnp.inf)
        l_scr[...] = jnp.zeros_like(l_scr)
        acc_scr[...] = jnp.zeros_like(acc_scr)

    def step(apply_mask):
        s = jax.lax.dot_general(
            q_ref[...], k_ref[...], (((1,), (1,)), ((), ())),
            preferred_element_type=jnp.float32) * scale
        if apply_mask:
            row = qi * tq + jax.lax.broadcasted_iota(jnp.int32, s.shape, 0)
            col = ki * tkv + jax.lax.broadcasted_iota(jnp.int32, s.shape, 1)
            s = jnp.where(col <= row, s, -1e30)
        m_prev = m_scr[...]
        m_new = jnp.maximum(m_prev, jnp.max(s, axis=-1, keepdims=True))
        alpha = jnp.exp(m_prev - m_new)
        p = jnp.exp(s - m_new)
        l_scr[...] = alpha * l_scr[...] + jnp.sum(p, axis=-1, keepdims=True)
        acc_scr[...] = alpha * acc_scr[...] + jnp.dot(
            p.astype(jnp.bfloat16), v_ref[...], preferred_element_type=jnp.float32)
        m_scr[...] = m_new

    # Fully-below-diagonal blocks need no mask; only the diagonal block is masked;
    # blocks above the diagonal are skipped entirely (and not DMA'd, see index maps).
    @pl.when(ki < qi)
    def _():
        step(apply_mask=False)

    @pl.when(ki == qi)
    def _():
        step(apply_mask=True)

    @pl.when(ki == pl.num_programs(3) - 1)
    def _():
        inv_l = pl.reciprocal(l_scr[...], approx=True)
        o_ref[...] = (acc_scr[...] * inv_l).astype(o_ref.dtype)


def pallas_flash_attention(qkv_heads, *, n_head, scale, tq_target=128):
    """qkv_heads (3H, B, Tp, hd) bf16 -> attention output (H, B, Tp, hd) bf16."""
    nH3, B, Tp, hd = qkv_heads.shape
    tq = _pick_tile(Tp, tq_target, 8)
    tkv = tq
    nq = Tp // tq

    def q_map(b, h, qi, ki):
        return (h, b, qi, 0)

    def k_map(b, h, qi, ki):
        # Clamp so causally-skipped kv steps repeat the previous block index and
        # Pallas suppresses the DMA (no HBM traffic for above-diagonal blocks).
        return (n_head + h, b, jnp.minimum(ki, qi), 0)

    def v_map(b, h, qi, ki):
        return (2 * n_head + h, b, jnp.minimum(ki, qi), 0)

    # TODO(synk): for head_dim < 128 the (tq, hd) tiles are not lane-dense; packing
    # multiple heads per block would improve vreg/MXU utilization further.
    return pl.pallas_call(
        functools.partial(_flash_attn_kernel, scale=scale, tq=tq, tkv=tkv),
        out_shape=jax.ShapeDtypeStruct((n_head, B, Tp, hd), jnp.bfloat16),
        grid=(B, n_head, nq, nq),
        in_specs=[
            pl.BlockSpec((None, None, tq, hd), q_map),
            pl.BlockSpec((None, None, tkv, hd), k_map),
            pl.BlockSpec((None, None, tkv, hd), v_map),
        ],
        out_specs=pl.BlockSpec((None, None, tq, hd),
                               lambda b, h, qi, ki: (h, b, qi, 0)),
        scratch_shapes=[
            pltpu.VMEM((tq, 1), jnp.float32),
            pltpu.VMEM((tq, 1), jnp.float32),
            pltpu.VMEM((tq, hd), jnp.float32),
        ],
        compiler_params=pltpu.CompilerParams(
            dimension_semantics=("parallel", "parallel", "parallel", "arbitrary")),
    )(qkv_heads, qkv_heads, qkv_heads)


# ----------------------------------------------------------------------------
# RoPE tables (matches the PyTorch module: bf16 tables, cat(freqs, freqs) layout,
# interleaved rotate_half)
# ----------------------------------------------------------------------------

def compute_rope(T, head_dim):
    inv_freq = 1.0 / (
        10000 ** (jnp.arange(0, head_dim, 2, dtype=jnp.bfloat16) / head_dim))
    t = jnp.arange(T, dtype=jnp.bfloat16)
    freqs = jnp.einsum("i,j->ij", t, inv_freq)
    emb = jnp.concatenate([freqs, freqs], axis=-1)          # (T, head_dim)
    return jnp.cos(emb).astype(jnp.float32), jnp.sin(emb).astype(jnp.float32)


def rotate_half_matrix(hd):
    # rotate_half(x) == x @ R  with  R[2i+1, 2i] = -1,  R[2i, 2i+1] = +1.
    m = jnp.arange(hd)[:, None]
    n = jnp.arange(hd)[None, :]
    r = (jnp.where((m % 2 == 0) & (n == m + 1), 1.0, 0.0)
         - jnp.where((m % 2 == 1) & (n == m - 1), 1.0, 0.0))
    return r.astype(jnp.bfloat16)


# ----------------------------------------------------------------------------
# Model forward (thin glue around the Pallas kernels)
# ----------------------------------------------------------------------------

def block_forward(p, x, *, B, Tp, n_head, cos_rows, sin_rows, rot, scale):
    Mp, C = x.shape
    hd = C // n_head

    # --- attention sub-block ---
    h1 = pallas_layernorm(x, p["ln1_g"], p["ln1_b"])                    # (Mp, C) bf16
    qkv = pallas_qkv_proj(h1, p["w_attn"], p["b_attn"], cos_rows, sin_rows, rot,
                          n_head=n_head)                                # (3H, Mp, hd) bf16
    qkv_heads = qkv.reshape(3 * n_head, B, Tp, hd)                      # free reshape
    y = pallas_flash_attention(qkv_heads, n_head=n_head, scale=scale)   # (H, B, Tp, hd)
    y = y.reshape(n_head, Mp, hd)                                       # free reshape
    # c_proj consumes head-major y directly (split-K over heads), residual fused.
    x = pallas_linear_headk(y, p["w_aproj"], p["b_aproj"], residual=x,
                            out_dtype=jnp.float32)                      # (Mp, C) f32

    # --- MLP sub-block ---
    h2 = pallas_layernorm(x, p["ln2_g"], p["ln2_b"])                    # bf16
    h2 = pallas_linear(h2, p["w_fc"], p["b_fc"], activation="gelu")     # (Mp, 4C) bf16
    x = pallas_linear(h2, p["w_mproj"], p["b_mproj"], residual=x,
                      out_dtype=jnp.float32)                            # (Mp, C) f32
    return x


def gpt_forward(params, idx, *, n_head, targets=None):
    B, T = idx.shape
    block_size, C = params["wpe"].shape
    vocab = params["wte"].shape[0]
    hd = C // n_head
    assert T <= block_size

    # Pad the sequence once (multiple of 8); everything stays padded until the end.
    Tp = _round_up(T, 8)
    idx_p = jnp.pad(idx, ((0, 0), (0, Tp - T))) if Tp != T else idx
    tok_emb = params["wte"][idx_p]                                      # (B, Tp, C) gather
    pos_emb = params["wpe"][:T]
    if Tp != T:
        pos_emb = jnp.pad(pos_emb, ((0, Tp - T), (0, 0)))
    x = (tok_emb + pos_emb).reshape(B * Tp, C)                          # f32 residual stream

    # RoPE tables: identical for every layer, computed once per forward.
    cos, sin = compute_rope(Tp, hd)
    cos_rows = jnp.tile(cos, (B, 1))                                    # (B*Tp, hd)
    sin_rows = jnp.tile(sin, (B, 1))
    rot = rotate_half_matrix(hd)
    scale = 1.0 / math.sqrt(hd)                                         # torch SDPA default

    for p in params["blocks"]:
        x = block_forward(p, x, B=B, Tp=Tp, n_head=n_head, cos_rows=cos_rows,
                          sin_rows=sin_rows, rot=rot, scale=scale)

    xf = pallas_layernorm(x, params["lnf_g"], params["lnf_b"])          # bf16
    logits = pallas_linear(xf, params["lm_head_w"], out_dtype=jnp.float32)
    logits = logits.reshape(B, Tp, -1)[:, :T, :vocab]
    # TODO(synk): cross-entropy loss (targets) and use_cache KV-cache decode path not implemented.
    return logits, None


# ----------------------------------------------------------------------------
# Deterministic parameter init (mirrors _init_weights; weights stored bf16 and
# pre-reshaped once into their kernel-friendly layouts)
# ----------------------------------------------------------------------------

def _xavier(key, out_f, in_f):
    bound = math.sqrt(6.0 / (in_f + out_f))
    return jax.random.uniform(key, (out_f, in_f), jnp.float32, -bound, bound)


def init_params(key, vocab_size, block_size, n_layer, n_head, n_embd):
    C = n_embd
    hd = C // n_head
    keys = jax.random.split(key, 2 + 4 * n_layer)
    ki = iter(range(len(keys)))

    # Tied wte / lm_head weight ends up xavier-initialized (torch apply() order).
    lm_w = _xavier(keys[next(ki)], vocab_size, C)                # (vocab, C)
    vocab_p = _round_up(vocab_size, 128)
    lm_head_w = lm_w.T                                           # (C, vocab)
    if vocab_p != vocab_size:
        lm_head_w = jnp.pad(lm_head_w, ((0, 0), (0, vocab_p - vocab_size)))

    params = {
        "wte": lm_w,                                             # f32 for embedding gather
        "lm_head_w": lm_head_w.astype(jnp.bfloat16),             # (C, vocab_padded) bf16
        "wpe": 0.02 * jax.random.normal(keys[next(ki)], (block_size, C), jnp.float32),
        "lnf_g": jnp.ones((1, C), jnp.float32),
        "lnf_b": jnp.zeros((1, C), jnp.float32),
        "blocks": [],
    }
    for _ in range(n_layer):
        w_attn = _xavier(keys[next(ki)], 3 * C, C).T             # (C, 3C): x @ w layout
        w_attn = w_attn.reshape(C, 3 * n_head, hd).transpose(1, 0, 2)   # (3H, C, hd)
        w_aproj = _xavier(keys[next(ki)], C, C).T.reshape(n_head, hd, C)  # (H, hd, C)
        w_fc = _xavier(keys[next(ki)], 4 * C, C).T               # (C, 4C)
        w_mproj = _xavier(keys[next(ki)], C, 4 * C).T            # (4C, C)
        blk = {
            "ln1_g": jnp.ones((1, C), jnp.float32),
            "ln1_b": jnp.zeros((1, C), jnp.float32),
            "w_attn": w_attn.astype(jnp.bfloat16),
            "b_attn": jnp.zeros((3 * n_head, 1, hd), jnp.float32),
            "w_aproj": w_aproj.astype(jnp.bfloat16),
            "b_aproj": jnp.zeros((1, C), jnp.float32),
            "ln2_g": jnp.ones((1, C), jnp.float32),
            "ln2_b": jnp.zeros((1, C), jnp.float32),
            "w_fc": w_fc.astype(jnp.bfloat16),
            "b_fc": jnp.zeros((1, 4 * C), jnp.float32),
            "w_mproj": w_mproj.astype(jnp.bfloat16),
            "b_mproj": jnp.zeros((1, C), jnp.float32),
        }
        params["blocks"].append(blk)
    return params


# ----------------------------------------------------------------------------
# main
# ----------------------------------------------------------------------------

if __name__ == "__main__":
    cfg = dict(vocab_size=128, block_size=16, n_layer=2, n_head=2, n_embd=32)
    root = jax.random.PRNGKey(0)
    k_params, k_idx = jax.random.split(root)

    params = init_params(k_params, **cfg)

    B, T = 2, 8
    idx = jax.random.randint(k_idx, (B, T), 0, cfg["vocab_size"], dtype=jnp.int32)

    fwd = jax.jit(functools.partial(gpt_forward, n_head=cfg["n_head"]))
    logits, loss = fwd(params, idx)
    logits = jax.block_until_ready(logits)

    assert logits.shape == (B, T, cfg["vocab_size"])
    assert logits.dtype == jnp.float32
    assert bool(jnp.all(jnp.isfinite(logits)))
    print("KERNEL_OK")
</pallas_src>

<mosaic_0001>
module attributes {stable_mosaic.version = 11 : i64} {
  func.func @_layernorm_kernel(%arg0: i32, %arg1: memref<16x32xf32, #tpu.memory_space<vmem>>, %arg2: memref<1x32xf32, #tpu.memory_space<vmem>>, %arg3: memref<1x32xf32, #tpu.memory_space<vmem>>, %arg4: memref<16x32xbf16, #tpu.memory_space<vmem>>) attributes {dimension_semantics = [#tpu.dimension_semantics<parallel>], iteration_bounds = array<i64: 1>, scalar_prefetch = 0 : i64, scratch_operands = 0 : i64, tpu.core_type = #tpu.core_type<tc>, window_params = [{transform_indices = @transform_0, window_bounds = array<i64: 16, 32>}, {pipeline_mode = #tpu.pipeline_mode<synchronous>, transform_indices = @transform_1, window_bounds = array<i64: 1, 32>}, {pipeline_mode = #tpu.pipeline_mode<synchronous>, transform_indices = @transform_2, window_bounds = array<i64: 1, 32>}, {transform_indices = @transform_3, window_bounds = array<i64: 16, 32>}]} {
    %c0 = arith.constant 0 : index
    %c0_0 = arith.constant 0 : index
    %0 = vector.load %arg1[%c0, %c0_0] : memref<16x32xf32, #tpu.memory_space<vmem>>, vector<16x32xf32>
    %cst = arith.constant dense<0.000000e+00> : vector<16xf32>
    %1 = vector.multi_reduction <add>, %0, %cst [1] : vector<16x32xf32> to vector<16xf32>
    %2 = vector.shape_cast %1 : vector<16xf32> to vector<16x1xf32>
    %cst_1 = arith.constant 3.200000e+01 : f32
    %3 = vector.broadcast %cst_1 : f32 to vector<16x1xf32>
    %4 = arith.divf %2, %3 : vector<16x1xf32>
    %5 = vector.broadcast %4 : vector<16x1xf32> to vector<16x32xf32>
    %6 = arith.subf %0, %5 : vector<16x32xf32>
    %7 = arith.mulf %6, %6 : vector<16x32xf32>
    %cst_2 = arith.constant dense<0.000000e+00> : vector<16xf32>
    %8 = vector.multi_reduction <add>, %7, %cst_2 [1] : vector<16x32xf32> to vector<16xf32>
    %9 = vector.shape_cast %8 : vector<16xf32> to vector<16x1xf32>
    %cst_3 = arith.constant 3.200000e+01 : f32
    %10 = vector.broadcast %cst_3 : f32 to vector<16x1xf32>
    %11 = arith.divf %9, %10 : vector<16x1xf32>
    %12 = vector.broadcast %4 : vector<16x1xf32> to vector<16x32xf32>
    %13 = arith.subf %0, %12 : vector<16x32xf32>
    %cst_4 = arith.constant 9.99999974E-6 : f32
    %14 = vector.broadcast %cst_4 : f32 to vector<16x1xf32>
    %15 = arith.addf %11, %14 : vector<16x1xf32>
    %16 = math.rsqrt %15 : vector<16x1xf32>
    %17 = vector.broadcast %16 : vector<16x1xf32> to vector<16x32xf32>
    %18 = arith.mulf %13, %17 : vector<16x32xf32>
    %c0_5 = arith.constant 0 : index
    %c0_6 = arith.constant 0 : index
    %19 = vector.load %arg2[%c0_5, %c0_6] : memref<1x32xf32, #tpu.memory_space<vmem>>, vector<1x32xf32>
    %20 = vector.broadcast %19 : vector<1x32xf32> to vector<16x32xf32>
    %21 = arith.mulf %18, %20 : vector<16x32xf32>
    %c0_7 = arith.constant 0 : index
    %c0_8 = arith.constant 0 : index
    %22 = vector.load %arg3[%c0_7, %c0_8] : memref<1x32xf32, #tpu.memory_space<vmem>>, vector<1x32xf32>
    %23 = vector.broadcast %22 : vector<1x32xf32> to vector<16x32xf32>
    %24 = arith.addf %21, %23 : vector<16x32xf32>
    %25 = arith.truncf %24 : vector<16x32xf32> to vector<16x32xbf16>
    %c0_9 = arith.constant 0 : index
    %c0_10 = arith.constant 0 : index
    %26 = vector.load %arg4[%c0_9, %c0_10] : memref<16x32xbf16, #tpu.memory_space<vmem>>, vector<16x32xbf16>
    tpu.vector_store %arg4[%c0_9, %c0_10], %25 {strides = array<i32>} : memref<16x32xbf16, #tpu.memory_space<vmem>>, vector<16x32xbf16>,
    return
  }
  func.func @transform_0(%arg0: i32) -> (i32, i32) {
    %c0_i32 = arith.constant 0 : i32
    %c0_i32_0 = arith.constant 0 : i32
    return %arg0, %c0_i32 : i32, i32
  }
  func.func @transform_1(%arg0: i32) -> (i32, i32) {
    %c0_i32 = arith.constant 0 : i32
    %c0_i32_0 = arith.constant 0 : i32
    %c0_i32_1 = arith.constant 0 : i32
    return %c0_i32, %c0_i32_0 : i32, i32
  }
  func.func @transform_2(%arg0: i32) -> (i32, i32) {
    %c0_i32 = arith.constant 0 : i32
    %c0_i32_0 = arith.constant 0 : i32
    %c0_i32_1 = arith.constant 0 : i32
    return %c0_i32, %c0_i32_0 : i32, i32
  }
  func.func @transform_3(%arg0: i32) -> (i32, i32) {
    %c0_i32 = arith.constant 0 : i32
    %c0_i32_0 = arith.constant 0 : i32
    return %arg0, %c0_i32 : i32, i32
  }
}

module attributes {stable_mosaic.version = 11 : i64} {
  func.func @_qkv_kernel(%arg0: i32, %arg1: i32, %arg2: i32, %arg3: memref<16x32xbf16, #tpu.memory_space<vmem>>, %arg4: memref<1x32x16xbf16, #tpu.memory_space<vmem>>, %arg5: memref<1x1x16xf32, #tpu.memory_space<vmem>>, %arg6: memref<16x16xf32, #tpu.memory_space<vmem>>, %arg7: memref<16x16xf32, #tpu.memory_space<vmem>>, %arg8: memref<16x16xbf16, #tpu.memory_space<vmem>>, %arg9: memref<1x16x16xbf16, #tpu.memory_space<vmem>>, %arg10: memref<16x16xf32, #tpu.memory_space<vmem>>) attributes {dimension_semantics = [#tpu.dimension_semantics<parallel>, #tpu.dimension_semantics<parallel>, #tpu.dimension_semantics<arbitrary>], iteration_bounds = array<i64: 1, 6, 1>, scalar_prefetch = 0 : i64, scratch_operands = 1 : i64, tpu.core_type = #tpu.core_type<tc>, window_params = [{transform_indices = @transform_0, window_bounds = array<i64: 16, 32>}, {transform_indices = @transform_1, window_bounds = array<i64: 1, 32, 16>}, {transform_indices = @transform_2, window_bounds = array<i64: 1, 1, 16>}, {transform_indices = @transform_3, window_bounds = array<i64: 16, 16>}, {transform_indices = @transform_4, window_bounds = array<i64: 16, 16>}, {pipeline_mode = #tpu.pipeline_mode<synchronous>, transform_indices = @transform_5, window_bounds = array<i64: 16, 16>}, {transform_indices = @transform_6, window_bounds = array<i64: 1, 16, 16>}]} {
    %c0_i32 = arith.constant 0 : i32
    %0 = arith.cmpi eq, %arg2, %c0_i32 : i32
    %1 = arith.extui %0 : i1 to i32
    %c0_i32_0 = arith.constant 0 : i32
    %2 = arith.cmpi ne, %1, %c0_i32_0 : i32
    scf.if %2 {
      %cst_14 = arith.constant 0.000000e+00 : f32
      %20 = vector.broadcast %cst_14 : f32 to vector<16x16xf32>
      %c0_15 = arith.constant 0 : index
      %c0_16 = arith.constant 0 : index
      %21 = vector.load %arg10[%c0_15, %c0_16] : memref<16x16xf32, #tpu.memory_space<vmem>>, vector<16x16xf32>
      tpu.vector_store %arg10[%c0_15, %c0_16], %20 {strides = array<i32>} : memref<16x16xf32, #tpu.memory_space<vmem>>, vector<16x16xf32>,
    } else {
    }
    %c0 = arith.constant 0 : index
    %c0_1 = arith.constant 0 : index
    %3 = vector.load %arg10[%c0, %c0_1] : memref<16x16xf32, #tpu.memory_space<vmem>>, vector<16x16xf32>
    %c0_2 = arith.constant 0 : index
    %c0_3 = arith.constant 0 : index
    %4 = vector.load %arg3[%c0_2, %c0_3] : memref<16x32xbf16, #tpu.memory_space<vmem>>, vector<16x32xbf16>
    %c0_4 = arith.constant 0 : index
    %c0_5 = arith.constant 0 : index
    %c0_6 = arith.constant 0 : index
    %5 = vector.load %arg4[%c0_4, %c0_5, %c0_6] : memref<1x32x16xbf16, #tpu.memory_space<vmem>>, vector<1x32x16xbf16>
    %6 = vector.shape_cast %5 : vector<1x32x16xbf16> to vector<32x16xbf16>
    %cst = arith.constant dense<0.000000e+00> : vector<16x16xf32>
    %7 = tpu.matmul %4, %6, %cst {dimension_numbers = #tpu.dot_dimension_numbers<[1], [0], [0], [1], [0, 0, 1, 1], [], []>} : vector<16x32xbf16>, vector<32x16xbf16>, vector<16x16xf32> -> vector<16x16xf32>
    %8 = arith.addf %3, %7 : vector<16x16xf32>
    %c0_7 = arith.constant 0 : index
    %c0_8 = arith.constant 0 : index
    %9 = vector.load %arg10[%c0_7, %c0_8] : memref<16x16xf32, #tpu.memory_space<vmem>>, vector<16x16xf32>
    tpu.vector_store %arg10[%c0_7, %c0_8], %8 {strides = array<i32>} : memref<16x16xf32, #tpu.memory_space<vmem>>, vector<16x16xf32>,
    %c0_i32_9 = arith.constant 0 : i32
    %10 = arith.cmpi eq, %arg2, %c0_i32_9 : i32
    %c4_i32 = arith.constant 4 : i32
    %11 = arith.cmpi slt, %arg1, %c4_i32 : i32
    %12 = arith.andi %10, %11 : i1
    %13 = arith.extui %12 : i1 to i32
    %c0_i32_10 = arith.constant 0 : i32
    %14 = arith.cmpi ne, %13, %c0_i32_10 : i32
    scf.if %14 {
      %c0_14 = arith.constant 0 : index
      %c0_15 = arith.constant 0 : index
      %20 = vector.load %arg10[%c0_14, %c0_15] : memref<16x16xf32, #tpu.memory_space<vmem>>, vector<16x16xf32>
      %c0_16 = arith.constant 0 : index
      %c0_17 = arith.constant 0 : index
      %c0_18 = arith.constant 0 : index
      %21 = vector.load %arg5[%c0_16, %c0_17, %c0_18] : memref<1x1x16xf32, #tpu.memory_space<vmem>>, vector<1x1x16xf32>
      %22 = vector.shape_cast %21 : vector<1x1x16xf32> to vector<1x16xf32>
      %23 = vector.broadcast %22 : vector<1x16xf32> to vector<16x16xf32>
      %24 = arith.addf %20, %23 : vector<16x16xf32>
      %25 = arith.truncf %24 : vector<16x16xf32> to vector<16x16xbf16>
      %c0_19 = arith.constant 0 : index
      %c0_20 = arith.constant 0 : index
      %26 = vector.load %arg8[%c0_19, %c0_20] : memref<16x16xbf16, #tpu.memory_space<vmem>>, vector<16x16xbf16>
      %cst_21 = arith.constant dense<0.000000e+00> : vector<16x16xf32>
      %27 = tpu.matmul %25, %26, %cst_21 {dimension_numbers = #tpu.dot_dimension_numbers<[1], [0], [0], [1], [0, 0, 1, 1], [], []>} : vector<16x16xbf16>, vector<16x16xbf16>, vector<16x16xf32> -> vector<16x16xf32>
      %c0_22 = arith.constant 0 : index
      %c0_23 = arith.constant 0 : index
      %28 = vector.load %arg6[%c0_22, %c0_23] : memref<16x16xf32, #tpu.memory_space<vmem>>, vector<16x16xf32>
      %29 = arith.mulf %24, %28 : vector<16x16xf32>
      %c0_24 = arith.constant 0 : index
      %c0_25 = arith.constant 0 : index
      %30 = vector.load %arg7[%c0_24, %c0_25] : memref<16x16xf32, #tpu.memory_space<vmem>>, vector<16x16xf32>
      %31 = arith.mulf %27, %30 : vector<16x16xf32>
      %32 = arith.addf %29, %31 : vector<16x16xf32>
      %33 = arith.truncf %32 : vector<16x16xf32> to vector<16x16xbf16>
      %c0_26 = arith.constant 0 : index
      %c0_27 = arith.constant 0 : index
      %c0_28 = arith.constant 0 : index
      %34 = vector.load %arg9[%c0_26, %c0_27, %c0_28] : memref<1x16x16xbf16, #tpu.memory_space<vmem>>, vector<1x16x16xbf16>
      %35 = vector.shape_cast %34 : vector<1x16x16xbf16> to vector<16x16xbf16>
      %36 = vector.shape_cast %33 : vector<16x16xbf16> to vector<1x16x16xbf16>
      tpu.vector_store %arg9[%c0_26, %c0_27, %c0_28], %36 {strides = array<i32>} : memref<1x16x16xbf16, #tpu.memory_space<vmem>>, vector<1x16x16xbf16>,
    } else {
    }
    %c0_i32_11 = arith.constant 0 : i32
    %15 = arith.cmpi eq, %arg2, %c0_i32_11 : i32
    %c4_i32_12 = arith.constant 4 : i32
    %16 = arith.cmpi sge, %arg1, %c4_i32_12 : i32
    %17 = arith.andi %15, %16 : i1
    %18 = arith.extui %17 : i1 to i32
    %c0_i32_13 = arith.constant 0 : i32
    %19 = arith.cmpi ne, %18, %c0_i32_13 : i32
    scf.if %19 {
      %c0_14 = arith.constant 0 : index
      %c0_15 = arith.constant 0 : index
      %20 = vector.load %arg10[%c0_14, %c0_15] : memref<16x16xf32, #tpu.memory_space<vmem>>, vector<16x16xf32>
      %c0_16 = arith.constant 0 : index
      %c0_17 = arith.constant 0 : index
      %c0_18 = arith.constant 0 : index
      %21 = vector.load %arg5[%c0_16, %c0_17, %c0_18] : memref<1x1x16xf32, #tpu.memory_space<vmem>>, vector<1x1x16xf32>
      %22 = vector.shape_cast %21 : vector<1x1x16xf32> to vector<1x16xf32>
      %23 = vector.broadcast %22 : vector<1x16xf32> to vector<16x16xf32>
      %24 = arith.addf %20, %23 : vector<16x16xf32>
      %25 = arith.truncf %24 : vector<16x16xf32> to vector<16x16xbf16>
      %c0_19 = arith.constant 0 : index
      %c0_20 = arith.constant 0 : index
      %c0_21 = arith.constant 0 : index
      %26 = vector.load %arg9[%c0_19, %c0_20, %c0_21] : memref<1x16x16xbf16, #tpu.memory_space<vmem>>, vector<1x16x16xbf16>
      %27 = vector.shape_cast %26 : vector<1x16x16xbf16> to vector<16x16xbf16>
      %28 = vector.shape_cast %25 : vector<16x16xbf16> to vector<1x16x16xbf16>
      tpu.vector_store %arg9[%c0_19, %c0_20, %c0_21], %28 {strides = array<i32>} : memref<1x16x16xbf16, #tpu.memory_space<vmem>>, vector<1x16x16xbf16>,
    } else {
    }
    return
  }
  func.func @transform_0(%arg0: i32, %arg1: i32, %arg2: i32) -> (i32, i32) {
    %c0_i32 = arith.constant 0 : i32
    return %arg0, %arg2 : i32, i32
  }
  func.func @transform_1(%arg0: i32, %arg1: i32, %arg2: i32) -> (i32, i32, i32) {
    %c0_i32 = arith.constant 0 : i32
    %c0_i32_0 = arith.constant 0 : i32
    return %arg1, %arg2, %c0_i32 : i32, i32, i32
  }
  func.func @transform_2(%arg0: i32, %arg1: i32, %arg2: i32) -> (i32, i32, i32) {
    %c0_i32 = arith.constant 0 : i32
    %c0_i32_0 = arith.constant 0 : i32
    %c0_i32_1 = arith.constant 0 : i32
    return %arg1, %c0_i32, %c0_i32_0 : i32, i32, i32
  }
  func.func @transform_3(%arg0: i32, %arg1: i32, %arg2: i32) -> (i32, i32) {
    %c0_i32 = arith.constant 0 : i32
    %c0_i32_0 = arith.constant 0 : i32
    return %arg0, %c0_i32 : i32, i32
  }
  func.func @transform_4(%arg0: i32, %arg1: i32, %arg2: i32) -> (i32, i32) {
    %c0_i32 = arith.constant 0 : i32
    %c0_i32_0 = arith.constant 0 : i32
    return %arg0, %c0_i32 : i32, i32
  }
  func.func @transform_5(%arg0: i32, %arg1: i32, %arg2: i32) -> (i32, i32) {
    %c0_i32 = arith.constant 0 : i32
    %c0_i32_0 = arith.constant 0 : i32
    %c0_i32_1 = arith.constant 0 : i32
    return %c0_i32, %c0_i32_0 : i32, i32
  }
  func.func @transform_6(%arg0: i32, %arg1: i32, %arg2: i32) -> (i32, i32, i32) {
    %c0_i32 = arith.constant 0 : i32
    %c0_i32_0 = arith.constant 0 : i32
    return %arg1, %arg0, %c0_i32 : i32, i32, i32
  }
}

module attributes {stable_mosaic.version = 11 : i64} {
  func.func @_flash_attn_kernel(%arg0: i32, %arg1: i32, %arg2: i32, %arg3: i32, %arg4: memref<1x1x8x16xbf16, #tpu.memory_space<vmem>>, %arg5: memref<1x1x8x16xbf16, #tpu.memory_space<vmem>>, %arg6: memref<1x1x8x16xbf16, #tpu.memory_space<vmem>>, %arg7: memref<1x1x8x16xbf16, #tpu.memory_space<vmem>>, %arg8: memref<8x1xf32, #tpu.memory_space<vmem>>, %arg9: memref<8x1xf32, #tpu.memory_space<vmem>>, %arg10: memref<8x16xf32, #tpu.memory_space<vmem>>) attributes {dimension_semantics = [#tpu.dimension_semantics<parallel>, #tpu.dimension_semantics<parallel>, #tpu.dimension_semantics<parallel>, #tpu.dimension_semantics<arbitrary>], iteration_bounds = array<i64: 2, 2, 1, 1>, scalar_prefetch = 0 : i64, scratch_operands = 3 : i64, tpu.core_type = #tpu.core_type<tc>, window_params = [{transform_indices = @transform_0, window_bounds = array<i64: 1, 1, 8, 16>}, {transform_indices = @transform_1, window_bounds = array<i64: 1, 1, 8, 16>}, {transform_indices = @transform_2, window_bounds = array<i64: 1, 1, 8, 16>}, {transform_indices = @transform_3, window_bounds = array<i64: 1, 1, 8, 16>}]} {
    %c0_i32 = arith.constant 0 : i32
    %0 = arith.cmpi eq, %arg3, %c0_i32 : i32
    %1 = arith.extui %0 : i1 to i32
    %c0_i32_0 = arith.constant 0 : i32
    %2 = arith.cmpi ne, %1, %c0_i32_0 : i32
    scf.if %2 {
      %cst = arith.constant 0xFF800000 : f32
      %12 = vector.broadcast %cst : f32 to vector<8x1xf32>
      %c0 = arith.constant 0 : index
      %c0_5 = arith.constant 0 : index
      %13 = vector.load %arg8[%c0, %c0_5] : memref<8x1xf32, #tpu.memory_space<vmem>>, vector<8x1xf32>
      tpu.vector_store %arg8[%c0, %c0_5], %12 {strides = array<i32>} : memref<8x1xf32, #tpu.memory_space<vmem>>, vector<8x1xf32>,
      %cst_6 = arith.constant 0.000000e+00 : f32
      %14 = vector.broadcast %cst_6 : f32 to vector<8x1xf32>
      %c0_7 = arith.constant 0 : index
      %c0_8 = arith.constant 0 : index
      %15 = vector.load %arg9[%c0_7, %c0_8] : memref<8x1xf32, #tpu.memory_space<vmem>>, vector<8x1xf32>
      tpu.vector_store %arg9[%c0_7, %c0_8], %14 {strides = array<i32>} : memref<8x1xf32, #tpu.memory_space<vmem>>, vector<8x1xf32>,
      %cst_9 = arith.constant 0.000000e+00 : f32
      %16 = vector.broadcast %cst_9 : f32 to vector<8x16xf32>
      %c0_10 = arith.constant 0 : index
      %c0_11 = arith.constant 0 : index
      %17 = vector.load %arg10[%c0_10, %c0_11] : memref<8x16xf32, #tpu.memory_space<vmem>>, vector<8x16xf32>
      tpu.vector_store %arg10[%c0_10, %c0_11], %16 {strides = array<i32>} : memref<8x16xf32, #tpu.memory_space<vmem>>, vector<8x16xf32>,
    } else {
    }
    %3 = arith.cmpi slt, %arg3, %arg2 : i32
    %4 = arith.extui %3 : i1 to i32
    %c0_i32_1 = arith.constant 0 : i32
    %5 = arith.cmpi ne, %4, %c0_i32_1 : i32
    scf.if %5 {
      %c0 = arith.constant 0 : index
      %c0_5 = arith.constant 0 : index
      %c0_6 = arith.constant 0 : index
      %c0_7 = arith.constant 0 : index
      %12 = vector.load %arg4[%c0, %c0_5, %c0_6, %c0_7] : memref<1x1x8x16xbf16, #tpu.memory_space<vmem>>, vector<1x1x8x16xbf16>
      %13 = vector.shape_cast %12 : vector<1x1x8x16xbf16> to vector<8x16xbf16>
      %c0_8 = arith.constant 0 : index
      %c0_9 = arith.constant 0 : index
      %c0_10 = arith.constant 0 : index
      %c0_11 = arith.constant 0 : index
      %14 = vector.load %arg5[%c0_8, %c0_9, %c0_10, %c0_11] : memref<1x1x8x16xbf16, #tpu.memory_space<vmem>>, vector<1x1x8x16xbf16>
      %15 = vector.shape_cast %14 : vector<1x1x8x16xbf16> to vector<8x16xbf16>
      %cst = arith.constant dense<0.000000e+00> : vector<8x8xf32>
      %16 = tpu.matmul %13, %15, %cst {dimension_numbers = #tpu.dot_dimension_numbers<[1], [1], [0], [0], [0, 0, 1, 0], [], []>} : vector<8x16xbf16>, vector<8x16xbf16>, vector<8x8xf32> -> vector<8x8xf32>
      %cst_12 = arith.constant 2.500000e-01 : f32
      %17 = vector.broadcast %cst_12 : f32 to vector<8x8xf32>
      %18 = arith.mulf %16, %17 : vector<8x8xf32>
      %c0_13 = arith.constant 0 : index
      %c0_14 = arith.constant 0 : index
      %19 = vector.load %arg8[%c0_13, %c0_14] : memref<8x1xf32, #tpu.memory_space<vmem>>, vector<8x1xf32>
      %cst_15 = arith.constant dense<0xFF800000> : vector<8xf32>
      %20 = vector.multi_reduction <maximumf>, %18, %cst_15 [1] : vector<8x8xf32> to vector<8xf32>
      %21 = vector.shape_cast %20 : vector<8xf32> to vector<8x1xf32>
      %22 = arith.maximumf %19, %21 : vector<8x1xf32>
      %23 = arith.subf %19, %22 : vector<8x1xf32>
      %24 = math.exp %23 : vector<8x1xf32>
      %25 = vector.broadcast %22 : vector<8x1xf32> to vector<8x8xf32>
      %26 = arith.subf %18, %25 : vector<8x8xf32>
      %27 = math.exp %26 : vector<8x8xf32>
      %c0_16 = arith.constant 0 : index
      %c0_17 = arith.constant 0 : index
      %28 = vector.load %arg9[%c0_16, %c0_17] : memref<8x1xf32, #tpu.memory_space<vmem>>, vector<8x1xf32>
      %29 = arith.mulf %24, %28 : vector<8x1xf32>
      %cst_18 = arith.constant dense<0.000000e+00> : vector<8xf32>
      %30 = vector.multi_reduction <add>, %27, %cst_18 [1] : vector<8x8xf32> to vector<8xf32>
      %31 = vector.shape_cast %30 : vector<8xf32> to vector<8x1xf32>
      %32 = arith.addf %29, %31 : vector<8x1xf32>
      %c0_19 = arith.constant 0 : index
      %c0_20 = arith.constant 0 : index
      %33 = vector.load %arg9[%c0_19, %c0_20] : memref<8x1xf32, #tpu.memory_space<vmem>>, vector<8x1xf32>
      tpu.vector_store %arg9[%c0_19, %c0_20], %32 {strides = array<i32>} : memref<8x1xf32, #tpu.memory_space<vmem>>, vector<8x1xf32>,
      %c0_21 = arith.constant 0 : index
      %c0_22 = arith.constant 0 : index
      %34 = vector.load %arg10[%c0_21, %c0_22] : memref<8x16xf32, #tpu.memory_space<vmem>>, vector<8x16xf32>
      %35 = vector.broadcast %24 : vector<8x1xf32> to vector<8x16xf32>
      %36 = arith.mulf %35, %34 : vector<8x16xf32>
      %37 = arith.truncf %27 : vector<8x8xf32> to vector<8x8xbf16>
      %c0_23 = arith.constant 0 : index
      %c0_24 = arith.constant 0 : index
      %c0_25 = arith.constant 0 : index
      %c0_26 = arith.constant 0 : index
      %38 = vector.load %arg6[%c0_23, %c0_24, %c0_25, %c0_26] : memref<1x1x8x16xbf16, #tpu.memory_space<vmem>>, vector<1x1x8x16xbf16>
      %39 = vector.shape_cast %38 : vector<1x1x8x16xbf16> to vector<8x16xbf16>
      %cst_27 = arith.constant dense<0.000000e+00> : vector<8x16xf32>
      %40 = tpu.matmul %37, %39, %cst_27 {dimension_numbers = #tpu.dot_dimension_numbers<[1], [0], [0], [1], [0, 0, 1, 1], [], []>} : vector<8x8xbf16>, vector<8x16xbf16>, vector<8x16xf32> -> vector<8x16xf32>
      %41 = arith.addf %36, %40 : vector<8x16xf32>
      %c0_28 = arith.constant 0 : index
      %c0_29 = arith.constant 0 : index
      %42 = vector.load %arg10[%c0_28, %c0_29] : memref<8x16xf32, #tpu.memory_space<vmem>>, vector<8x16xf32>
      tpu.vector_store %arg10[%c0_28, %c0_29], %41 {strides = array<i32>} : memref<8x16xf32, #tpu.memory_space<vmem>>, vector<8x16xf32>,
      %c0_30 = arith.constant 0 : index
      %c0_31 = arith.constant 0 : index
      %43 = vector.load %arg8[%c0_30, %c0_31] : memref<8x1xf32, #tpu.memory_space<vmem>>, vector<8x1xf32>
      tpu.vector_store %arg8[%c0_30, %c0_31], %22 {strides = array<i32>} : memref<8x1xf32, #tpu.memory_space<vmem>>, vector<8x1xf32>,
    } else {
    }
    %6 = arith.cmpi eq, %arg3, %arg2 : i32
    %7 = arith.extui %6 : i1 to i32
    %c0_i32_2 = arith.constant 0 : i32
    %8 = arith.cmpi ne, %7, %c0_i32_2 : i32
    scf.if %8 {
      %c0 = arith.constant 0 : index
      %c0_5 = arith.constant 0 : index
      %c0_6 = arith.constant 0 : index
      %c0_7 = arith.constant 0 : index
      %12 = vector.load %arg4[%c0, %c0_5, %c0_6, %c0_7] : memref<1x1x8x16xbf16, #tpu.memory_space<vmem>>, vector<1x1x8x16xbf16>
      %13 = vector.shape_cast %12 : vector<1x1x8x16xbf16> to vector<8x16xbf16>
      %c0_8 = arith.constant 0 : index
      %c0_9 = arith.constant 0 : index
      %c0_10 = arith.constant 0 : index
      %c0_11 = arith.constant 0 : index
      %14 = vector.load %arg5[%c0_8, %c0_9, %c0_10, %c0_11] : memref<1x1x8x16xbf16, #tpu.memory_space<vmem>>, vector<1x1x8x16xbf16>
      %15 = vector.shape_cast %14 : vector<1x1x8x16xbf16> to vector<8x16xbf16>
      %cst = arith.constant dense<0.000000e+00> : vector<8x8xf32>
      %16 = tpu.matmul %13, %15, %cst {dimension_numbers = #tpu.dot_dimension_numbers<[1], [1], [0], [0], [0, 0, 1, 0], [], []>} : vector<8x16xbf16>, vector<8x16xbf16>, vector<8x8xf32> -> vector<8x8xf32>
      %cst_12 = arith.constant 2.500000e-01 : f32
      %17 = vector.broadcast %cst_12 : f32 to vector<8x8xf32>
      %18 = arith.mulf %16, %17 : vector<8x8xf32>
      %c8_i32 = arith.constant 8 : i32
      %19 = arith.muli %arg2, %c8_i32 : i32
      %20 = tpu.iota {dimensions = array<i32: 0>} : vector<8x8xi32>
      %21 = vector.broadcast %19 : i32 to vector<8x8xi32>
      %22 = arith.addi %21, %20 : vector<8x8xi32>
      %c8_i32_13 = arith.constant 8 : i32
      %23 = arith.muli %arg3, %c8_i32_13 : i32
      %24 = tpu.iota {dimensions = array<i32: 1>} : vector<8x8xi32>
      %25 = vector.broadcast %23 : i32 to vector<8x8xi32>
      %26 = arith.addi %25, %24 : vector<8x8xi32>
      %27 = arith.cmpi sle, %26, %22 : vector<8x8xi32>
      %cst_14 = arith.constant -1.000000e+30 : f32
      %28 = vector.broadcast %cst_14 : f32 to vector<8x8xf32>
      %29 = arith.select %27, %18, %28 : vector<8x8xi1>, vector<8x8xf32>
      %c0_15 = arith.constant 0 : index
      %c0_16 = arith.constant 0 : index
      %30 = vector.load %arg8[%c0_15, %c0_16] : memref<8x1xf32, #tpu.memory_space<vmem>>, vector<8x1xf32>
      %cst_17 = arith.constant dense<0xFF800000> : vector<8xf32>
      %31 = vector.multi_reduction <maximumf>, %29, %cst_17 [1] : vector<8x8xf32> to vector<8xf32>
      %32 = vector.shape_cast %31 : vector<8xf32> to vector<8x1xf32>
      %33 = arith.maximumf %30, %32 : vector<8x1xf32>
      %34 = arith.subf %30, %33 : vector<8x1xf32>
      %35 = math.exp %34 : vector<8x1xf32>
      %36 = vector.broadcast %33 : vector<8x1xf32> to vector<8x8xf32>
      %37 = arith.subf %29, %36 : vector<8x8xf32>
      %38 = math.exp %37 : vector<8x8xf32>
      %c0_18 = arith.constant 0 : index
      %c0_19 = arith.constant 0 : index
      %39 = vector.load %arg9[%c0_18, %c0_19] : memref<8x1xf32, #tpu.memory_space<vmem>>, vector<8x1xf32>
      %40 = arith.mulf %35, %39 : vector<8x1xf32>
      %cst_20 = arith.constant dense<0.000000e+00> : vector<8xf32>
      %41 = vector.multi_reduction <add>, %38, %cst_20 [1] : vector<8x8xf32> to vector<8xf32>
      %42 = vector.shape_cast %41 : vector<8xf32> to vector<8x1xf32>
      %43 = arith.addf %40, %42 : vector<8x1xf32>
      %c0_21 = arith.constant 0 : index
      %c0_22 = arith.constant 0 : index
      %44 = vector.load %arg9[%c0_21, %c0_22] : memref<8x1xf32, #tpu.memory_space<vmem>>, vector<8x1xf32>
      tpu.vector_store %arg9[%c0_21, %c0_22], %43 {strides = array<i32>} : memref<8x1xf32, #tpu.memory_space<vmem>>, vector<8x1xf32>,
      %c0_23 = arith.constant 0 : index
      %c0_24 = arith.constant 0 : index
      %45 = vector.load %arg10[%c0_23, %c0_24] : memref<8x16xf32, #tpu.memory_space<vmem>>, vector<8x16xf32>
      %46 = vector.broadcast %35 : vector<8x1xf32> to vector<8x16xf32>
      %47 = arith.mulf %46, %45 : vector<8x16xf32>
      %48 = arith.truncf %38 : vector<8x8xf32> to vector<8x8xbf16>
      %c0_25 = arith.constant 0 : index
      %c0_26 = arith.constant 0 : index
      %c0_27 = arith.constant 0 : index
      %c0_28 = arith.constant 0 : index
      %49 = vector.load %arg6[%c0_25, %c0_26, %c0_27, %c0_28] : memref<1x1x8x16xbf16, #tpu.memory_space<vmem>>, vector<1x1x8x16xbf16>
      %50 = vector.shape_cast %49 : vector<1x1x8x16xbf16> to vector<8x16xbf16>
      %cst_29 = arith.constant dense<0.000000e+00> : vector<8x16xf32>
      %51 = tpu.matmul %48, %50, %cst_29 {dimension_numbers = #tpu.dot_dimension_numbers<[1], [0], [0], [1], [0, 0, 1, 1], [], []>} : vector<8x8xbf16>, vector<8x16xbf16>, vector<8x16xf32> -> vector<8x16xf32>
      %52 = arith.addf %47, %51 : vector<8x16xf32>
      %c0_30 = arith.constant 0 : index
      %c0_31 = arith.constant 0 : index
      %53 = vector.load %arg10[%c0_30, %c0_31] : memref<8x16xf32, #tpu.memory_space<vmem>>, vector<8x16xf32>
      tpu.vector_store %arg10[%c0_30, %c0_31], %52 {strides = array<i32>} : memref<8x16xf32, #tpu.memory_space<vmem>>, vector<8x16xf32>,
      %c0_32 = arith.constant 0 : index
      %c0_33 = arith.constant 0 : index
      %54 = vector.load %arg8[%c0_32, %c0_33] : memref<8x1xf32, #tpu.memory_space<vmem>>, vector<8x1xf32>
      tpu.vector_store %arg8[%c0_32, %c0_33], %33 {strides = array<i32>} : memref<8x1xf32, #tpu.memory_space<vmem>>, vector<8x1xf32>,
    } else {
    }
    %c0_i32_3 = arith.constant 0 : i32
    %9 = arith.cmpi eq, %arg3, %c0_i32_3 : i32
    %10 = arith.extui %9 : i1 to i32
    %c0_i32_4 = arith.constant 0 : i32
    %11 = arith.cmpi ne, %10, %c0_i32_4 : i32
    scf.if %11 {
      %c0 = arith.constant 0 : index
      %c0_5 = arith.constant 0 : index
      %12 = vector.load %arg9[%c0, %c0_5] : memref<8x1xf32, #tpu.memory_space<vmem>>, vector<8x1xf32>
      %13 = tpu.reciprocal %12 {approx = true} : vector<8x1xf32> -> vector<8x1xf32>
      %c0_6 = arith.constant 0 : index
      %c0_7 = arith.constant 0 : index
      %14 = vector.load %arg10[%c0_6, %c0_7] : memref<8x16xf32, #tpu.memory_space<vmem>>, vector<8x16xf32>
      %15 = vector.broadcast %13 : vector<8x1xf32> to vector<8x16xf32>
      %16 = arith.mulf %14, %15 : vector<8x16xf32>
      %17 = arith.truncf %16 : vector<8x16xf32> to vector<8x16xbf16>
      %c0_8 = arith.constant 0 : index
      %c0_9 = arith.constant 0 : index
      %c0_10 = arith.constant 0 : index
      %c0_11 = arith.constant 0 : index
      %18 = vector.load %arg7[%c0_8, %c0_9, %c0_10, %c0_11] : memref<1x1x8x16xbf16, #tpu.memory_space<vmem>>, vector<1x1x8x16xbf16>
      %19 = vector.shape_cast %18 : vector<1x1x8x16xbf16> to vector<8x16xbf16>
      %20 = vector.shape_cast %17 : vector<8x16xbf16> to vector<1x1x8x16xbf16>
      tpu.vector_store %arg7[%c0_8, %c0_9, %c0_10, %c0_11], %20 {strides = array<i32>} : memref<1x1x8x16xbf16, #tpu.memory_space<vmem>>, vector<1x1x8x16xbf16>,
    } else {
    }
    return
  }
  func.func @transform_0(%arg0: i32, %arg1: i32, %arg2: i32, %arg3: i32) -> (i32, i32, i32, i32) {
    %c0_i32 = arith.constant 0 : i32
    %c0_i32_0 = arith.constant 0 : i32
    return %arg1, %arg0, %arg2, %c0_i32 : i32, i32, i32, i32
  }
  func.func @transform_1(%arg0: i32, %arg1: i32, %arg2: i32, %arg3: i32) -> (i32, i32, i32, i32) {
    %c2_i32 = arith.constant 2 : i32
    %0 = arith.addi %c2_i32, %arg1 : i32
    %1 = arith.minsi %arg3, %arg2 : i32
    %c0_i32 = arith.constant 0 : i32
    %c0_i32_0 = arith.constant 0 : i32
    return %0, %arg0, %1, %c0_i32 : i32, i32, i32, i32
  }
  func.func @transform_2(%arg0: i32, %arg1: i32, %arg2: i32, %arg3: i32) -> (i32, i32, i32, i32) {
    %c4_i32 = arith.constant 4 : i32
    %0 = arith.addi %c4_i32, %arg1 : i32
    %1 = arith.minsi %arg3, %arg2 : i32
    %c0_i32 = arith.constant 0 : i32
    %c0_i32_0 = arith.constant 0 : i32
    return %0, %arg0, %1, %c0_i32 : i32, i32, i32, i32
  }
  func.func @transform_3(%arg0: i32, %arg1: i32, %arg2: i32, %arg3: i32) -> (i32, i32, i32, i32) {
    %c0_i32 = arith.constant 0 : i32
    %c0_i32_0 = arith.constant 0 : i32
    return %arg1, %arg0, %arg2, %c0_i32 : i32, i32, i32, i32
  }
}

module attributes {stable_mosaic.version = 11 : i64} {
  func.func @kernel(%arg0: i32, %arg1: i32, %arg2: i32, %arg3: memref<1x16x16xbf16, #tpu.memory_space<vmem>>, %arg4: memref<1x16x32xbf16, #tpu.memory_space<vmem>>, %arg5: memref<1x32xf32, #tpu.memory_space<vmem>>, %arg6: memref<16x32xf32, #tpu.memory_space<vmem>>, %arg7: memref<16x32xf32, #tpu.memory_space<vmem>>, %arg8: memref<16x32xf32, #tpu.memory_space<vmem>>) attributes {dimension_semantics = [#tpu.dimension_semantics<parallel>, #tpu.dimension_semantics<parallel>, #tpu.dimension_semantics<arbitrary>], iteration_bounds = array<i64: 1, 1, 2>, scalar_prefetch = 0 : i64, scratch_operands = 1 : i64, tpu.core_type = #tpu.core_type<tc>, window_params = [{transform_indices = @transform_0, window_bounds = array<i64: 1, 16, 16>}, {transform_indices = @transform_1, window_bounds = array<i64: 1, 16, 32>}, {transform_indices = @transform_2, window_bounds = array<i64: 1, 32>}, {transform_indices = @transform_3, window_bounds = array<i64: 16, 32>}, {transform_indices = @transform_4, window_bounds = array<i64: 16, 32>}]} {
    %c0_i32 = arith.constant 0 : i32
    %0 = arith.cmpi eq, %arg2, %c0_i32 : i32
    %1 = arith.extui %0 : i1 to i32
    %c0_i32_0 = arith.constant 0 : i32
    %2 = arith.cmpi ne, %1, %c0_i32_0 : i32
    scf.if %2 {
      %cst_11 = arith.constant 0.000000e+00 : f32
      %14 = vector.broadcast %cst_11 : f32 to vector<16x32xf32>
      %c0_12 = arith.constant 0 : index
      %c0_13 = arith.constant 0 : index
      %15 = vector.load %arg8[%c0_12, %c0_13] : memref<16x32xf32, #tpu.memory_space<vmem>>, vector<16x32xf32>
      tpu.vector_store %arg8[%c0_12, %c0_13], %14 {strides = array<i32>} : memref<16x32xf32, #tpu.memory_space<vmem>>, vector<16x32xf32>,
    } else {
    }
    %c0 = arith.constant 0 : index
    %c0_1 = arith.constant 0 : index
    %3 = vector.load %arg8[%c0, %c0_1] : memref<16x32xf32, #tpu.memory_space<vmem>>, vector<16x32xf32>
    %c0_2 = arith.constant 0 : index
    %c0_3 = arith.constant 0 : index
    %c0_4 = arith.constant 0 : index
    %4 = vector.load %arg3[%c0_2, %c0_3, %c0_4] : memref<1x16x16xbf16, #tpu.memory_space<vmem>>, vector<1x16x16xbf16>
    %5 = vector.shape_cast %4 : vector<1x16x16xbf16> to vector<16x16xbf16>
    %c0_5 = arith.constant 0 : index
    %c0_6 = arith.constant 0 : index
    %c0_7 = arith.constant 0 : index
    %6 = vector.load %arg4[%c0_5, %c0_6, %c0_7] : memref<1x16x32xbf16, #tpu.memory_space<vmem>>, vector<1x16x32xbf16>
    %7 = vector.shape_cast %6 : vector<1x16x32xbf16> to vector<16x32xbf16>
    %cst = arith.constant dense<0.000000e+00> : vector<16x32xf32>
    %8 = tpu.matmul %5, %7, %cst {dimension_numbers = #tpu.dot_dimension_numbers<[1], [0], [0], [1], [0, 0, 1, 1], [], []>} : vector<16x16xbf16>, vector<16x32xbf16>, vector<16x32xf32> -> vector<16x32xf32>
    %9 = arith.addf %3, %8 : vector<16x32xf32>
    %c0_8 = arith.constant 0 : index
    %c0_9 = arith.constant 0 : index
    %10 = vector.load %arg8[%c0_8, %c0_9] : memref<16x32xf32, #tpu.memory_space<vmem>>, vector<16x32xf32>
    tpu.vector_store %arg8[%c0_8, %c0_9], %9 {strides = array<i32>} : memref<16x32xf32, #tpu.memory_space<vmem>>, vector<16x32xf32>,
    %c1_i32 = arith.constant 1 : i32
    %11 = arith.cmpi eq, %arg2, %c1_i32 : i32
    %12 = arith.extui %11 : i1 to i32
    %c0_i32_10 = arith.constant 0 : i32
    %13 = arith.cmpi ne, %12, %c0_i32_10 : i32
    scf.if %13 {
      %c0_11 = arith.constant 0 : index
      %c0_12 = arith.constant 0 : index
      %14 = vector.load %arg8[%c0_11, %c0_12] : memref<16x32xf32, #tpu.memory_space<vmem>>, vector<16x32xf32>
      %c0_13 = arith.constant 0 : index
      %c0_14 = arith.constant 0 : index
      %15 = vector.load %arg5[%c0_13, %c0_14] : memref<1x32xf32, #tpu.memory_space<vmem>>, vector<1x32xf32>
      %16 = vector.broadcast %15 : vector<1x32xf32> to vector<16x32xf32>
      %17 = arith.addf %14, %16 : vector<16x32xf32>
      %c0_15 = arith.constant 0 : index
      %c0_16 = arith.constant 0 : index
      %18 = vector.load %arg6[%c0_15, %c0_16] : memref<16x32xf32, #tpu.memory_space<vmem>>, vector<16x32xf32>
      %19 = arith.addf %17, %18 : vector<16x32xf32>
      %c0_17 = arith.constant 0 : index
      %c0_18 = arith.constant 0 : index
      %20 = vector.load %arg7[%c0_17, %c0_18] : memref<16x32xf32, #tpu.memory_space<vmem>>, vector<16x32xf32>
      tpu.vector_store %arg7[%c0_17, %c0_18], %19 {strides = array<i32>} : memref<16x32xf32, #tpu.memory_space<vmem>>, vector<16x32xf32>,
    } else {
    }
    return
  }
  func.func @transform_0(%arg0: i32, %arg1: i32, %arg2: i32) -> (i32, i32, i32) {
    %c0_i32 = arith.constant 0 : i32
    %c0_i32_0 = arith.constant 0 : i32
    return %arg2, %arg0, %c0_i32 : i32, i32, i32
  }
  func.func @transform_1(%arg0: i32, %arg1: i32, %arg2: i32) -> (i32, i32, i32) {
    %c0_i32 = arith.constant 0 : i32
    %c0_i32_0 = arith.constant 0 : i32
    return %arg2, %c0_i32, %arg1 : i32, i32, i32
  }
  func.func @transform_2(%arg0: i32, %arg1: i32, %arg2: i32) -> (i32, i32) {
    %c0_i32 = arith.constant 0 : i32
    %c0_i32_0 = arith.constant 0 : i32
    return %c0_i32, %arg1 : i32, i32
  }
  func.func @transform_3(%arg0: i32, %arg1: i32, %arg2: i32) -> (i32, i32) {
    %c0_i32 = arith.constant 0 : i32
    return %arg0, %arg1 : i32, i32
  }
  func.func @transform_4(%arg0: i32, %arg1: i32, %arg2: i32) -> (i32, i32) {
    %c0_i32 = arith.constant 0 : i32
    return %arg0, %arg1 : i32, i32
  }
}

module attributes {stable_mosaic.version = 11 : i64} {
  func.func @kernel(%arg0: i32, %arg1: i32, %arg2: i32, %arg3: memref<16x128xbf16, #tpu.memory_space<vmem>>, %arg4: memref<128x32xbf16, #tpu.memory_space<vmem>>, %arg5: memref<1x32xf32, #tpu.memory_space<vmem>>, %arg6: memref<16x32xf32, #tpu.memory_space<vmem>>, %arg7: memref<16x32xf32, #tpu.memory_space<vmem>>, %arg8: memref<16x32xf32, #tpu.memory_space<vmem>>) attributes {dimension_semantics = [#tpu.dimension_semantics<parallel>, #tpu.dimension_semantics<parallel>, #tpu.dimension_semantics<arbitrary>], iteration_bounds = array<i64: 1, 1, 1>, scalar_prefetch = 0 : i64, scratch_operands = 1 : i64, tpu.core_type = #tpu.core_type<tc>, window_params = [{transform_indices = @transform_0, window_bounds = array<i64: 16, 128>}, {transform_indices = @transform_1, window_bounds = array<i64: 128, 32>}, {transform_indices = @transform_2, window_bounds = array<i64: 1, 32>}, {transform_indices = @transform_3, window_bounds = array<i64: 16, 32>}, {transform_indices = @transform_4, window_bounds = array<i64: 16, 32>}]} {
    %c0_i32 = arith.constant 0 : i32
    %0 = arith.cmpi eq, %arg2, %c0_i32 : i32
    %1 = arith.extui %0 : i1 to i32
    %c0_i32_0 = arith.constant 0 : i32
    %2 = arith.cmpi ne, %1, %c0_i32_0 : i32
    scf.if %2 {
      %cst_10 = arith.constant 0.000000e+00 : f32
      %12 = vector.broadcast %cst_10 : f32 to vector<16x32xf32>
      %c0_11 = arith.constant 0 : index
      %c0_12 = arith.constant 0 : index
      %13 = vector.load %arg8[%c0_11, %c0_12] : memref<16x32xf32, #tpu.memory_space<vmem>>, vector<16x32xf32>
      tpu.vector_store %arg8[%c0_11, %c0_12], %12 {strides = array<i32>} : memref<16x32xf32, #tpu.memory_space<vmem>>, vector<16x32xf32>,
    } else {
    }
    %c0 = arith.constant 0 : index
    %c0_1 = arith.constant 0 : index
    %3 = vector.load %arg8[%c0, %c0_1] : memref<16x32xf32, #tpu.memory_space<vmem>>, vector<16x32xf32>
    %c0_2 = arith.constant 0 : index
    %c0_3 = arith.constant 0 : index
    %4 = vector.load %arg3[%c0_2, %c0_3] : memref<16x128xbf16, #tpu.memory_space<vmem>>, vector<16x128xbf16>
    %c0_4 = arith.constant 0 : index
    %c0_5 = arith.constant 0 : index
    %5 = vector.load %arg4[%c0_4, %c0_5] : memref<128x32xbf16, #tpu.memory_space<vmem>>, vector<128x32xbf16>
    %cst = arith.constant dense<0.000000e+00> : vector<16x32xf32>
    %6 = tpu.matmul %4, %5, %cst {dimension_numbers = #tpu.dot_dimension_numbers<[1], [0], [0], [1], [0, 0, 1, 1], [], []>} : vector<16x128xbf16>, vector<128x32xbf16>, vector<16x32xf32> -> vector<16x32xf32>
    %7 = arith.addf %3, %6 : vector<16x32xf32>
    %c0_6 = arith.constant 0 : index
    %c0_7 = arith.constant 0 : index
    %8 = vector.load %arg8[%c0_6, %c0_7] : memref<16x32xf32, #tpu.memory_space<vmem>>, vector<16x32xf32>
    tpu.vector_store %arg8[%c0_6, %c0_7], %7 {strides = array<i32>} : memref<16x32xf32, #tpu.memory_space<vmem>>, vector<16x32xf32>,
    %c0_i32_8 = arith.constant 0 : i32
    %9 = arith.cmpi eq, %arg2, %c0_i32_8 : i32
    %10 = arith.extui %9 : i1 to i32
    %c0_i32_9 = arith.constant 0 : i32
    %11 = arith.cmpi ne, %10, %c0_i32_9 : i32
    scf.if %11 {
      %c0_10 = arith.constant 0 : index
      %c0_11 = arith.constant 0 : index
      %12 = vector.load %arg8[%c0_10, %c0_11] : memref<16x32xf32, #tpu.memory_space<vmem>>, vector<16x32xf32>
      %c0_12 = arith.constant 0 : index
      %c0_13 = arith.constant 0 : index
      %13 = vector.load %arg5[%c0_12, %c0_13] : memref<1x32xf32, #tpu.memory_space<vmem>>, vector<1x32xf32>
      %14 = vector.broadcast %13 : vector<1x32xf32> to vector<16x32xf32>
      %15 = arith.addf %12, %14 : vector<16x32xf32>
      %c0_14 = arith.constant 0 : index
      %c0_15 = arith.constant 0 : index
      %16 = vector.load %arg6[%c0_14, %c0_15] : memref<16x32xf32, #tpu.memory_space<vmem>>, vector<16x32xf32>
      %17 = arith.addf %15, %16 : vector<16x32xf32>
      %c0_16 = arith.constant 0 : index
      %c0_17 = arith.constant 0 : index
      %18 = vector.load %arg7[%c0_16, %c0_17] : memref<16x32xf32, #tpu.memory_space<vmem>>, vector<16x32xf32>
      tpu.vector_store %arg7[%c0_16, %c0_17], %17 {strides = array<i32>} : memref<16x32xf32, #tpu.memory_space<vmem>>, vector<16x32xf32>,
    } else {
    }
    return
  }
  func.func @transform_0(%arg0: i32, %arg1: i32, %arg2: i32) -> (i32, i32) {
    %c0_i32 = arith.constant 0 : i32
    return %arg0, %arg2 : i32, i32
  }
  func.func @transform_1(%arg0: i32, %arg1: i32, %arg2: i32) -> (i32, i32) {
    %c0_i32 = arith.constant 0 : i32
    return %arg2, %arg1 : i32, i32
  }
  func.func @transform_2(%arg0: i32, %arg1: i32, %arg2: i32) -> (i32, i32) {
    %c0_i32 = arith.constant 0 : i32
    %c0_i32_0 = arith.constant 0 : i32
    return %c0_i32, %arg1 : i32, i32
  }
  func.func @transform_3(%arg0: i32, %arg1: i32, %arg2: i32) -> (i32, i32) {
    %c0_i32 = arith.constant 0 : i32
    return %arg0, %arg1 : i32, i32
  }
  func.func @transform_4(%arg0: i32, %arg1: i32, %arg2: i32) -> (i32, i32) {
    %c0_i32 = arith.constant 0 : i32
    return %arg0, %arg1 : i32, i32
  }
}

module attributes {stable_mosaic.version = 11 : i64} {
  func.func @kernel(%arg0: i32, %arg1: i32, %arg2: i32, %arg3: memref<16x32xbf16, #tpu.memory_space<vmem>>, %arg4: memref<32x128xbf16, #tpu.memory_space<vmem>>, %arg5: memref<16x128xf32, #tpu.memory_space<vmem>>, %arg6: memref<16x128xf32, #tpu.memory_space<vmem>>) attributes {dimension_semantics = [#tpu.dimension_semantics<parallel>, #tpu.dimension_semantics<parallel>, #tpu.dimension_semantics<arbitrary>], iteration_bounds = array<i64: 1, 1, 1>, scalar_prefetch = 0 : i64, scratch_operands = 1 : i64, tpu.core_type = #tpu.core_type<tc>, window_params = [{transform_indices = @transform_0, window_bounds = array<i64: 16, 32>}, {transform_indices = @transform_1, window_bounds = array<i64: 32, 128>}, {transform_indices = @transform_2, window_bounds = array<i64: 16, 128>}]} {
    %c0_i32 = arith.constant 0 : i32
    %0 = arith.cmpi eq, %arg2, %c0_i32 : i32
    %1 = arith.extui %0 : i1 to i32
    %c0_i32_0 = arith.constant 0 : i32
    %2 = arith.cmpi ne, %1, %c0_i32_0 : i32
    scf.if %2 {
      %cst_10 = arith.constant 0.000000e+00 : f32
      %12 = vector.broadcast %cst_10 : f32 to vector<16x128xf32>
      %c0_11 = arith.constant 0 : index
      %c0_12 = arith.constant 0 : index
      %13 = vector.load %arg6[%c0_11, %c0_12] : memref<16x128xf32, #tpu.memory_space<vmem>>, vector<16x128xf32>
      tpu.vector_store %arg6[%c0_11, %c0_12], %12 {strides = array<i32>} : memref<16x128xf32, #tpu.memory_space<vmem>>, vector<16x128xf32>,
    } else {
    }
    %c0 = arith.constant 0 : index
    %c0_1 = arith.constant 0 : index
    %3 = vector.load %arg6[%c0, %c0_1] : memref<16x128xf32, #tpu.memory_space<vmem>>, vector<16x128xf32>
    %c0_2 = arith.constant 0 : index
    %c0_3 = arith.constant 0 : index
    %4 = vector.load %arg3[%c0_2, %c0_3] : memref<16x32xbf16, #tpu.memory_space<vmem>>, vector<16x32xbf16>
    %c0_4 = arith.constant 0 : index
    %c0_5 = arith.constant 0 : index
    %5 = vector.load %arg4[%c0_4, %c0_5] : memref<32x128xbf16, #tpu.memory_space<vmem>>, vector<32x128xbf16>
    %cst = arith.constant dense<0.000000e+00> : vector<16x128xf32>
    %6 = tpu.matmul %4, %5, %cst {dimension_numbers = #tpu.dot_dimension_numbers<[1], [0], [0], [1], [0, 0, 1, 1], [], []>} : vector<16x32xbf16>, vector<32x128xbf16>, vector<16x128xf32> -> vector<16x128xf32>
    %7 = arith.addf %3, %6 : vector<16x128xf32>
    %c0_6 = arith.constant 0 : index
    %c0_7 = arith.constant 0 : index
    %8 = vector.load %arg6[%c0_6, %c0_7] : memref<16x128xf32, #tpu.memory_space<vmem>>, vector<16x128xf32>
    tpu.vector_store %arg6[%c0_6, %c0_7], %7 {strides = array<i32>} : memref<16x128xf32, #tpu.memory_space<vmem>>, vector<16x128xf32>,
    %c0_i32_8 = arith.constant 0 : i32
    %9 = arith.cmpi eq, %arg2, %c0_i32_8 : i32
    %10 = arith.extui %9 : i1 to i32
    %c0_i32_9 = arith.constant 0 : i32
    %11 = arith.cmpi ne, %10, %c0_i32_9 : i32
    scf.if %11 {
      %c0_10 = arith.constant 0 : index
      %c0_11 = arith.constant 0 : index
      %12 = vector.load %arg6[%c0_10, %c0_11] : memref<16x128xf32, #tpu.memory_space<vmem>>, vector<16x128xf32>
      %c0_12 = arith.constant 0 : index
      %c0_13 = arith.constant 0 : index
      %13 = vector.load %arg5[%c0_12, %c0_13] : memref<16x128xf32, #tpu.memory_space<vmem>>, vector<16x128xf32>
      tpu.vector_store %arg5[%c0_12, %c0_13], %12 {strides = array<i32>} : memref<16x128xf32, #tpu.memory_space<vmem>>, vector<16x128xf32>,
    } else {
    }
    return
  }
  func.func @transform_0(%arg0: i32, %arg1: i32, %arg2: i32) -> (i32, i32) {
    %c0_i32 = arith.constant 0 : i32
    return %arg0, %arg2 : i32, i32
  }
  func.func @transform_1(%arg0: i32, %arg1: i32, %arg2: i32) -> (i32, i32) {
    %c0_i32 = arith.constant 0 : i32
    return %arg2, %arg1 : i32, i32
  }
  func.func @transform_2(%arg0: i32, %arg1: i32, %arg2: i32) -> (i32, i32) {
    %c0_i32 = arith.constant 0 : i32
    return %arg0, %arg1 : i32, i32
  }
}

module attributes {stable_mosaic.version = 11 : i64} {
  func.func @kernel(%arg0: i32, %arg1: i32, %arg2: i32, %arg3: memref<16x32xbf16, #tpu.memory_space<vmem>>, %arg4: memref<32x128xbf16, #tpu.memory_space<vmem>>, %arg5: memref<1x128xf32, #tpu.memory_space<vmem>>, %arg6: memref<16x128xbf16, #tpu.memory_space<vmem>>, %arg7: memref<16x128xf32, #tpu.memory_space<vmem>>) attributes {dimension_semantics = [#tpu.dimension_semantics<parallel>, #tpu.dimension_semantics<parallel>, #tpu.dimension_semantics<arbitrary>], iteration_bounds = array<i64: 1, 1, 1>, scalar_prefetch = 0 : i64, scratch_operands = 1 : i64, tpu.core_type = #tpu.core_type<tc>, window_params = [{transform_indices = @transform_0, window_bounds = array<i64: 16, 32>}, {transform_indices = @transform_1, window_bounds = array<i64: 32, 128>}, {transform_indices = @transform_2, window_bounds = array<i64: 1, 128>}, {transform_indices = @transform_3, window_bounds = array<i64: 16, 128>}]} {
    %c0_i32 = arith.constant 0 : i32
    %0 = arith.cmpi eq, %arg2, %c0_i32 : i32
    %1 = arith.extui %0 : i1 to i32
    %c0_i32_0 = arith.constant 0 : i32
    %2 = arith.cmpi ne, %1, %c0_i32_0 : i32
    scf.if %2 {
      %cst_10 = arith.constant 0.000000e+00 : f32
      %12 = vector.broadcast %cst_10 : f32 to vector<16x128xf32>
      %c0_11 = arith.constant 0 : index
      %c0_12 = arith.constant 0 : index
      %13 = vector.load %arg7[%c0_11, %c0_12] : memref<16x128xf32, #tpu.memory_space<vmem>>, vector<16x128xf32>
      tpu.vector_store %arg7[%c0_11, %c0_12], %12 {strides = array<i32>} : memref<16x128xf32, #tpu.memory_space<vmem>>, vector<16x128xf32>,
    } else {
    }
    %c0 = arith.constant 0 : index
    %c0_1 = arith.constant 0 : index
    %3 = vector.load %arg7[%c0, %c0_1] : memref<16x128xf32, #tpu.memory_space<vmem>>, vector<16x128xf32>
    %c0_2 = arith.constant 0 : index
    %c0_3 = arith.constant 0 : index
    %4 = vector.load %arg3[%c0_2, %c0_3] : memref<16x32xbf16, #tpu.memory_space<vmem>>, vector<16x32xbf16>
    %c0_4 = arith.constant 0 : index
    %c0_5 = arith.constant 0 : index
    %5 = vector.load %arg4[%c0_4, %c0_5] : memref<32x128xbf16, #tpu.memory_space<vmem>>, vector<32x128xbf16>
    %cst = arith.constant dense<0.000000e+00> : vector<16x128xf32>
    %6 = tpu.matmul %4, %5, %cst {dimension_numbers = #tpu.dot_dimension_numbers<[1], [0], [0], [1], [0, 0, 1, 1], [], []>} : vector<16x32xbf16>, vector<32x128xbf16>, vector<16x128xf32> -> vector<16x128xf32>
    %7 = arith.addf %3, %6 : vector<16x128xf32>
    %c0_6 = arith.constant 0 : index
    %c0_7 = arith.constant 0 : index
    %8 = vector.load %arg7[%c0_6, %c0_7] : memref<16x128xf32, #tpu.memory_space<vmem>>, vector<16x128xf32>
    tpu.vector_store %arg7[%c0_6, %c0_7], %7 {strides = array<i32>} : memref<16x128xf32, #tpu.memory_space<vmem>>, vector<16x128xf32>,
    %c0_i32_8 = arith.constant 0 : i32
    %9 = arith.cmpi eq, %arg2, %c0_i32_8 : i32
    %10 = arith.extui %9 : i1 to i32
    %c0_i32_9 = arith.constant 0 : i32
    %11 = arith.cmpi ne, %10, %c0_i32_9 : i32
    scf.if %11 {
      %c0_10 = arith.constant 0 : index
      %c0_11 = arith.constant 0 : index
      %12 = vector.load %arg7[%c0_10, %c0_11] : memref<16x128xf32, #tpu.memory_space<vmem>>, vector<16x128xf32>
      %c0_12 = arith.constant 0 : index
      %c0_13 = arith.constant 0 : index
      %13 = vector.load %arg5[%c0_12, %c0_13] : memref<1x128xf32, #tpu.memory_space<vmem>>, vector<1x128xf32>
      %14 = vector.broadcast %13 : vector<1x128xf32> to vector<16x128xf32>
      %15 = arith.addf %12, %14 : vector<16x128xf32>
      %cst_14 = arith.constant 5.000000e-01 : f32
      %16 = vector.broadcast %cst_14 : f32 to vector<16x128xf32>
      %17 = arith.mulf %16, %15 : vector<16x128xf32>
      %cst_15 = arith.constant 4.471500e-02 : f32
      %18 = vector.broadcast %cst_15 : f32 to vector<16x128xf32>
      %19 = arith.mulf %18, %15 : vector<16x128xf32>
      %20 = arith.mulf %19, %15 : vector<16x128xf32>
      %21 = arith.mulf %20, %15 : vector<16x128xf32>
      %22 = arith.addf %15, %21 : vector<16x128xf32>
      %cst_16 = arith.constant 0.797884583 : f32
      %23 = vector.broadcast %cst_16 : f32 to vector<16x128xf32>
      %24 = arith.mulf %23, %22 : vector<16x128xf32>
      %25 = math.tanh %24 : vector<16x128xf32>
      %cst_17 = arith.constant 1.000000e+00 : f32
      %26 = vector.broadcast %cst_17 : f32 to vector<16x128xf32>
      %27 = arith.addf %26, %25 : vector<16x128xf32>
      %28 = arith.mulf %17, %27 : vector<16x128xf32>
      %29 = arith.truncf %28 : vector<16x128xf32> to vector<16x128xbf16>
      %c0_18 = arith.constant 0 : index
      %c0_19 = arith.constant 0 : index
      %30 = vector.load %arg6[%c0_18, %c0_19] : memref<16x128xbf16, #tpu.memory_space<vmem>>, vector<16x128xbf16>
      tpu.vector_store %arg6[%c0_18, %c0_19], %29 {strides = array<i32>} : memref<16x128xbf16, #tpu.memory_space<vmem>>, vector<16x128xbf16>,
    } else {
    }
    return
  }
  func.func @transform_0(%arg0: i32, %arg1: i32, %arg2: i32) -> (i32, i32) {
    %c0_i32 = arith.constant 0 : i32
    return %arg0, %arg2 : i32, i32
  }
  func.func @transform_1(%arg0: i32, %arg1: i32, %arg2: i32) -> (i32, i32) {
    %c0_i32 = arith.constant 0 : i32
    return %arg2, %arg1 : i32, i32
  }
  func.func @transform_2(%arg0: i32, %arg1: i32, %arg2: i32) -> (i32, i32) {
    %c0_i32 = arith.constant 0 : i32
    %c0_i32_0 = arith.constant 0 : i32
    return %c0_i32, %arg1 : i32, i32
  }
  func.func @transform_3(%arg0: i32, %arg1: i32, %arg2: i32) -> (i32, i32) {
    %c0_i32 = arith.constant 0 : i32
    return %arg0, %arg1 : i32, i32
  }
}

</mosaic_0001>

<bundles_post_ra>
// kernel: gpt_forward.16
= control target key start
LH: loop header
LB: loop body
LE: loop exit
PB: predicated region body
PF: predicated region fallthrough
CT: control target
= control target key end

     0   :  { %vm16_vm0 = vcmask 261120   ;;  %vm70_vm1 = vcmask 257024   ;;  %s129_s0 = inlined_call_operand.vmem [shape: f32[16,32], index: 0, kind: input, shape index: {}]   ;;  %s130_s1 = inlined_call_operand.vmem [shape: f32[1,32], index: 1, kind: input, shape index: {}]   ;;  %s131_s2 = inlined_call_operand.vmem [shape: f32[1,32], index: 2, kind: input, shape index: {}]   ;;  %s132_s3 = inlined_call_operand.vmem [shape: bf16[16,32], index: 3, kind: output, shape index: {}]  }
   0x1   :  { %v14_v0 = vld [vmem:[%s129_s0] sm:$0xff]  ;;  %v15_v1 = vld [vmem:[%s129_s0 + $0x8] sm:$0xff] }
   0x2   :  { %v17_v2 = vsel %vm16_vm0, %v14_v0, 0.0  ;;  %v20_v3 = vsel %vm16_vm0, %v15_v1, 0.0  ;;  %v77_v21 = vld [vmem:[%s130_s1] ss:$0 sm:$0xff] }
   0x3   :  { %18 = vadd.xlane.f32.xlu0 %v17_v2  ;;  %v78_v23 = vld [vmem:[%s131_s2] ss:$0 sm:$0xff] }
   0x7   :  { %21 = vadd.xlane.f32.xlu0 %v20_v3 }
  0x90   :  { %v19_v4 = vpop.xlane.xlu0 %18 }
  0x91   :  { %v24_v5 = vmul.f32 0.03125, %v19_v4 }
  0x93   :  { %v26_v6 = vsub.f32 %v14_v0, %v24_v5 }
  0x94   :  { %v22_v7 = vpop.xlane.xlu0 %21 }
  0x95   :  { %v25_v8 = vmul.f32 0.03125, %v22_v7  ;;  %v28_v9 = vmul.f32 %v26_v6, %v26_v6 }
  0x97   :  { %v27_v10 = vsub.f32 %v15_v1, %v25_v8  ;;  %v30_v11 = vsel %vm16_vm0, %v28_v9, 0.0 }
  0x98   :  { %31 = vadd.xlane.f32.xlu1 %v30_v11 }
  0x99   :  { %v29_v12 = vmul.f32 %v27_v10, %v27_v10 }
  0x9b   :  { %v33_v13 = vsel %vm16_vm0, %v29_v12, 0.0 }
  0x9c   :  { %34 = vadd.xlane.f32.xlu1 %v33_v13 }
 0x125   :  { %v32_v14 = vpop.xlane.xlu1 %31 }
 0x126   :  { %v36_v15 = vmul.f32 0.03125, %v32_v14 }
 0x128   :  { %v38_v16 = vadd.f32 1e-05, %v36_v15 }
 0x129   :  { %v35_v17 = vpop.xlane.xlu1 %34 }
 0x12a   :  { %83 = vrsqrt.f32 %v38_v16  ;;  %v37_v18 = vmul.f32 0.03125, %v35_v17 }
 0x12c   :  { %v39_v19 = vadd.f32 1e-05, %v37_v18 }
 0x12e   :  { %85 = vrsqrt.f32 %v39_v19 }
 0x134   :  { %v84_v20 = vpop.eup %83 }
 0x135   :  { %v42_v22 = vmul.f32 %v84_v20, %v26_v6 }
 0x137   :  { %v51_v24 = vmul.f32 %v77_v21, %v42_v22 }
 0x138   :  { %v86_v25 = vpop.eup %85 }
 0x139   :  { %v60_v26 = vadd.f32 %v78_v23, %v51_v24  ;;  %v43_v27 = vmul.f32 %v86_v25, %v27_v10 }
 0x13b   :  { %v81_v28 = vpack.c.bf16 %v60_v26, %v60_v26  ;;  %v52_v29 = vmul.f32 %v77_v21, %v43_v27 }
 0x13d   :  { %71 = vst.msk [vmem:[%s132_s3] sm:$0xf] %vm70_vm1, %v81_v28  ;;  %v61_v30 = vadd.f32 %v78_v23, %v52_v29 }
 0x13f   :  { %v82_v31 = vpack.c.bf16 %v61_v30, %v61_v30 }
 0x141   :  { %72 = vst.msk [vmem:[%s132_s3 + $0x4] sm:$0xf] %vm70_vm1, %v82_v31 }

// kernel: gpt_forward.17
= control target key start
LH: loop header
LB: loop body
LE: loop exit
PB: predicated region body
PF: predicated region fallthrough
CT: control target
= control target key end

     0   :  { %s886_s21 = smov 0   ;;  %s888_s22 = smov 0   ;;  %s961_s0 = inlined_call_operand.vmem [shape: bf16[16,32], index: 0, kind: input, shape index: {}]   ;;  %s962_s1 = inlined_call_operand.vmem [shape: bf16[6,32,16], index: 1, kind: input, shape index: {}]   ;;  %s963_s2 = inlined_call_operand.vmem [shape: f32[6,1,16], index: 2, kind: input, shape index: {}]   ;;  %s964_s3 = inlined_call_operand.vmem [shape: f32[16,16], index: 3, kind: input, shape index: {}]   ;;  %s965_s4 = inlined_call_operand.vmem [shape: f32[16,16], index: 4, kind: input, shape index: {}]   ;;  %s966_s5 = inlined_call_operand.vmem [shape: bf16[16,16], index: 5, kind: input, shape index: {}]   ;;  %s967_s6 = inlined_call_operand.vmem [shape: bf16[6,16,16], index: 6, kind: output, shape index: {}]  }
   0x1   :  { %s890_s23 = smov 0  }
   0x2 LB: > { %s31_s24 = sadd.s32 1, %s841_s22  ;;  %p743_p0 = scmp.ge.s32.totalorder %s845_s23, 1  ;;  %s845_s23 = sphi %s890_s23, %s16_s23   ;;  %s841_s22 = sphi %s888_s22, %s969_s22   ;;  %s837_s21 = sphi %s886_s21, %s968_s21  }
   0x3   : > { %p33_p1 = scmp.ge.s32.totalorder %s31_s24, 6  ;;  %p286_p2 = scmp.lt.s32.totalorder %s845_s23, 7 }
   0x5   : > { %s971_s24 = smov (%p33_p1, %s31_s24), 0  ;;  %p287_p3 = pnand %p743_p0, %p286_p2 }
   0x6   : > { %p355_p4 = scmp.lt.s32.totalorder (!%p287_p3), %s837_s21, 5  ;;  %v847_v0 = vmov (!%p287_p3), 0.0   ;;  %vm848_vm0 = vmmov (!%p287_p3), 0   ;;  %vm394_vm1 = vcmask (!%p287_p3), 130048   ;;  %v821_v3 = vld [vmem:[%s961_s0] sm:$0xff] (!%p287_p3)   ;;  %vm422_vm2 = vcmask (!%p287_p3), 261120  }
   0x7   : > { %290 = sbr.rel (%p287_p3) target bundleno = 487 (0x1e7), region = 44  ;;  %777 = vmatprep.subr.bf16.mxu0 (!%p287_p3), %v847_v0  ;;  %781 = vmatprep.mubr.msk.bf16.mxu0 (!%p287_p3), %vm848_vm0, %v847_v0  ;;  %395 = vst.msk [vmem:[#allocation2] sm:$0xff] (!%p287_p3), %vm394_vm1, %v847_v0  ;;  %396 = vst.msk [vmem:[#allocation2 + $0x8] sm:$0xff] (!%p287_p3), %vm394_vm1, %v847_v0  ;;  %p472_p5 = scmp.lt.s32.totalorder (!%p287_p3), %s837_s21, 4 }
   0xe   : > { %s356_s25 = scalar_select %p355_p4, %s837_s21, 5  ;;  %v397_v4 = vld [vmem:[#allocation2] sm:$0xff]  ;;  %v398_v6 = vld [vmem:[#allocation2 + $0x8] sm:$0xff] }
   0xf   : > { %v822_v12 = vld [vmem:[%s966_s5] sm:$0xff] (%p472_p5)   ;;  %v849_v13 = vmov (%p472_p5), 0.0   ;;  %vm850_vm3 = vmmov (%p472_p5), 0   ;;  %v542_v22 = vld [vmem:[%s964_s3 + $0x8] sm:$0xff] (%p472_p5)  ;;  %vm559_vm4 = vcmask (%p472_p5), 125952  }
  0x10   : > { %s764_s26 = sshll.u32 %s356_s25, 4  ;;  %s913_s29 = scalar_lea.vmem %s963_s2, %s356_s25  ;;  %v541_v20 = vld [vmem:[%s964_s3] sm:$0xff] (%p472_p5)  ;;  %v546_v25 = vld [vmem:[%s965_s4 + $0x8] sm:$0xff] (%p472_p5) }
  0x11   : > { %s362_s8 = scalar_lea.vmem %s962_s1, %s764_s26  ;;  %s765_s9 = sshll.u32 %s356_s25, 3  ;;  %v753_v16 = vld [vmem:[%s913_s29] ss:$0 sm:$0xff] (%p472_p5) }
  0x12   : > { %s921_s12 = scalar_lea.vmem %s967_s6, %s765_s9  ;;  %v819_v1 = vld [vmem:[%s362_s8] sm:$0xff]   ;;  %v820_v2 = vld [vmem:[%s362_s8 + $0x8] sm:$0xff]  }
  0x13   : > { %778 = vmatpush3.bf16.msra.mxu0 %v819_v1  ;;  %v545_v21 = vld [vmem:[%s965_s4] sm:$0xff] (%p472_p5) }
  0x14   : > { %779 = vmatprep.subr.bf16.mxu0 %v847_v0 }
  0x17   : > { %780 = vmatpush3.bf16.msra.mxu0 %v820_v2 }
  0x18   : > { %785 = vmatprep.subr.bf16.mxu0 (%p472_p5), %v849_v13 }
  0x1a   : > { %782 = vmatmul.mubr.msk.bf16.vlgmr.msra.gmra.mrb[0].mxu0 %vm422_vm2, %v821_v3 }
  0x1b   : > { %786 = vmatpush3.bf16.msra.mxu0 (%p472_p5), %v822_v12  ;;  %787 = vmatprep.mubr.msk.bf16.mxu0 (%p472_p5), %vm850_vm3, %v849_v13 }
  0xec   : > { %476 = sbr.rel (!%p472_p5) target bundleno = 475 (0x1db), region = 52 }
  0xed   : > { %v460_v5 = vpop.f32.mrb[0].mxu0 }
  0xee   : > { %v467_v7 = vadd.f32 %v460_v5, %v397_v4  ;;  %v783_v8 = vpop.f32.mrb[1].mxu0 }
  0xef   : > { %v463_v9 = vpop.f32.mrb[2].mxu0 }
  0xf0   : > { %470 = vst.msk [vmem:[#allocation2] sm:$0xff] %vm394_vm1, %v467_v7  ;;  %v468_v10 = vadd.f32 %v463_v9, %v398_v6  ;;  %v784_v11 = vpop.f32.mrb[3].mxu0 }
  0xf2   : > { %471 = vst.msk [vmem:[#allocation2 + $0x8] sm:$0xff] %vm394_vm1, %v468_v10 }
  0xf7   : > { %v477_v14 = vld [vmem:[#allocation2] sm:$0xff] }
  0xf8   : > { %v486_v17 = vadd.f32 %v753_v16, %v477_v14 }
  0xf9   : > { %v478_v15 = vld [vmem:[#allocation2 + $0x8] sm:$0xff] }
  0xfa   : > { %v487_v18 = vadd.f32 %v753_v16, %v478_v15  ;;  %v543_v23 = vmul.f32 %v541_v20, %v486_v17 }
  0xfc   : > { %v488_v19 = vpack.c.bf16 %v487_v18, %v486_v17  ;;  %v544_v28 = vmul.f32 %v542_v22, %v487_v18 }
  0xfe   : > { %788 = vmatmul.mubr.msk.bf16.vlgmr.msra.gmra.mrb[0].mxu0 %vm394_vm1, %v488_v19 }
 0x1d1   : > { %v534_v24 = vpop.f32.mrb[0].mxu0 }
 0x1d2   : > { %v547_v26 = vmul.f32 %v545_v21, %v534_v24  ;;  %v789_v27 = vpop.f32.mrb[1].mxu0 }
 0x1d3   : > { %v537_v29 = vpop.f32.mrb[2].mxu0 }
 0x1d4   : > { %v549_v30 = vadd.f32 %v547_v26, %v543_v23  ;;  %v548_v31 = vmul.f32 %v546_v25, %v537_v29  ;;  %v790_v32 = vpop.f32.mrb[3].mxu0 }
 0x1d6   : > { %v767_v33 = vpack.c.bf16 %v549_v30, %v549_v30  ;;  %v550_v34 = vadd.f32 %v548_v31, %v544_v28 }
 0x1d8   : > { %560 = vst.msk [vmem:[%s921_s12] sm:$0xf] %vm559_vm4, %v767_v33  ;;  %v768_v35 = vpack.c.bf16 %v550_v34, %v550_v34 }
 0x1da   : > { %561 = vst.msk [vmem:[%s921_s12 + $0x4] sm:$0xf] %vm559_vm4, %v768_v35 }
 0x1db PF: > { %p562_p6 = scmp.ge.s32.totalorder %s837_s21, 4 }
 0x1dc   : > { %v759_v37 = vld [vmem:[%s913_s29] ss:$0 sm:$0xff] (%p562_p6)  ;;  %vm586_vm5 = vcmask (%p562_p6), 125952  }
 0x1dd   : > { %566 = sbr.rel (!%p562_p6) target bundleno = 487 (0x1e7), region = 56 }
 0x1df   : > { %v567_v36 = vld [vmem:[#allocation2] sm:$0xff] (%p562_p6) }
 0x1e0   : > { %v576_v39 = vadd.f32 (%p562_p6), %v759_v37, %v567_v36 }
 0x1e1   : > { %v568_v38 = vld [vmem:[#allocation2 + $0x8] sm:$0xff] (%p562_p6) }
 0x1e2   : > { %v577_v40 = vadd.f32 (%p562_p6), %v759_v37, %v568_v38  ;;  %v770_v41 = vpack.c.bf16 (%p562_p6), %v576_v39, %v576_v39 }
 0x1e4   : > { %v771_v42 = vpack.c.bf16 %v577_v40, %v577_v40  ;;  %587 = vst.msk [vmem:[%s921_s12] sm:$0xf] %vm586_vm5, %v770_v41 }
 0x1e6   : > { %588 = vst.msk [vmem:[%s921_s12 + $0x4] sm:$0xf] %vm586_vm5, %v771_v42 }
 0x1e7 PF: > { %s16_s23 = sadd.s32 1, %s845_s23   ;;  %s968_s21 = smov %s841_s22 }
 0x1e8   : > { %p13_p7 = scmp.ge.s32.totalorder %s16_s23, 8   ;;  %s969_s22 = smov %s971_s24 }
 0x1ea   :  { %15 = sbr.rel (!%p13_p7) target bundleno = 2 (0x2), region = 98 }

// kernel: gpt_forward.19
= control target key start
LH: loop header
LB: loop body
LE: loop exit
PB: predicated region body
PF: predicated region fallthrough
CT: control target
= control target key end

     0   :  { %s656_s15 = smov 0   ;;  %s658_s16 = smov 0   ;;  %s714_s0 = inlined_call_operand.vmem [shape: bf16[2,16,16], index: 0, kind: input, shape index: {}]   ;;  %s715_s1 = inlined_call_operand.vmem [shape: bf16[2,16,32], index: 1, kind: input, shape index: {}]   ;;  %s716_s2 = inlined_call_operand.vmem [shape: f32[1,32], index: 2, kind: input, shape index: {}]   ;;  %s717_s3 = inlined_call_operand.vmem [shape: f32[16,32], index: 3, kind: input, shape index: {}]   ;;  %s718_s4 = inlined_call_operand.vmem [shape: f32[16,32], index: 4, kind: output, shape index: {}]  }
   0x1   :  { %s660_s17 = smov 0  }
   0x2 LB: > { %s26_s18 = sadd.s32 1, %s622_s16  ;;  %p550_p0 = scmp.ge.s32.totalorder %s626_s17, 1  ;;  %s626_s17 = sphi %s660_s17, %s14_s17   ;;  %s622_s16 = sphi %s658_s16, %s720_s16   ;;  %s618_s15 = sphi %s656_s15, %s719_s15  }
   0x3   : > { %p27_p1 = scmp.ge.s32.totalorder %s26_s18, 2  ;;  %p229_p2 = scmp.lt.s32.totalorder %s626_s17, 3 }
   0x5   : > { %s722_s18 = smov (%p27_p1, %s26_s18), 0  ;;  %p230_p3 = pnand %p550_p0, %p229_p2 }
   0x6   : > { %p282_p4 = scmp.lt.s32.totalorder (!%p230_p3), %s618_s15, 1  ;;  %p555_p5 = scmp.ne.s32.totalorder (!%p230_p3), %s618_s15, 0 }
   0x7   : > { %233 = sbr.rel (%p230_p3) target bundleno = 256 (0x100), region = 36 }
   0xe   : > { %s283_s19 = scalar_select %p282_p4, %s618_s15, 1 }
   0xf   : > { %324 = sbr.rel (%p555_p5) target bundleno = 22 (0x16), region = 40  ;;  %vm325_vm0 = vcmask (!%p555_p5), 261120   ;;  %v628_v0 = vmov (!%p555_p5), 0.0  }
  0x10   : > { %s565_s20 = sshll.u32 %s283_s19, 3  ;;  %326 = vst.msk [vmem:[#allocation2] sm:$0xff] (!%p555_p5), %vm325_vm0, %v628_v0  ;;  %327 = vst.msk [vmem:[#allocation2 + $0x8] sm:$0xff] (!%p555_p5), %vm325_vm0, %v628_v0 }
  0x11   : > { %s289_s23 = scalar_lea.vmem %s714_s0, %s565_s20  ;;  %s298_s26 = scalar_lea.vmem %s715_s1, %s565_s20 }
  0x16 PF: > { %v602_v1 = vld [vmem:[%s298_s26] sm:$0xff]   ;;  %v629_v2 = vmov 0.0   ;;  %vm630_vm1 = vmmov 0   ;;  %vm345_vm2 = vcmask 130048   ;;  %vm392_vm3 = vcmask 261120   ;;  %p559_p6 = scmp.ne.s32.totalorder %s618_s15, 1 }
  0x17   : > { %569 = vmatprep.subr.bf16.mxu0 %v629_v2  ;;  %v603_v3 = vld [vmem:[%s289_s23] sm:$0xff]   ;;  %571 = vmatprep.mubr.msk.bf16.mxu0 %vm630_vm1, %v629_v2  ;;  %v329_v6 = vld [vmem:[#allocation2 + $0x8] sm:$0xff] }
  0x18   : > { %570 = vmatpush3.bf16.msra.mxu0 %v602_v1  ;;  %v328_v4 = vld [vmem:[#allocation2] sm:$0xff]  ;;  %v411_v17 = vld [vmem:[%s717_s3 + $0x8] sm:$0xff] (!%p559_p6) }
  0x19   : > { %v560_v13 = vld [vmem:[%s716_s2] ss:$0 sm:$0xff] (!%p559_p6) }
  0x1a   : > { %v410_v14 = vld [vmem:[%s717_s3] sm:$0xff] (!%p559_p6) }
  0x1b   : > { %572 = vmatmul.mubr.msk.bf16.vlgmr.msra.gmra.mrb[0].mxu0 %vm345_vm2, %v603_v3 }
  0xed   : > { %398 = sbr.rel (%p559_p6) target bundleno = 256 (0x100), region = 44 }
  0xee   : > { %v383_v5 = vpop.f32.mrb[0].mxu0 }
  0xef   : > { %v390_v7 = vadd.f32 %v383_v5, %v328_v4  ;;  %v573_v8 = vpop.f32.mrb[1].mxu0 }
  0xf0   : > { %v386_v9 = vpop.f32.mrb[2].mxu0 }
  0xf1   : > { %393 = vst.msk [vmem:[#allocation2] sm:$0xff] %vm392_vm3, %v390_v7  ;;  %v391_v10 = vadd.f32 %v386_v9, %v329_v6  ;;  %v574_v11 = vpop.f32.mrb[3].mxu0 }
  0xf3   : > { %394 = vst.msk [vmem:[#allocation2 + $0x8] sm:$0xff] %vm392_vm3, %v391_v10 }
  0xf8   : > { %v399_v12 = vld [vmem:[#allocation2] sm:$0xff] }
  0xf9   : > { %v408_v15 = vadd.f32 %v560_v13, %v399_v12 }
  0xfa   : > { %v400_v16 = vld [vmem:[#allocation2 + $0x8] sm:$0xff] }
  0xfb   : > { %v409_v18 = vadd.f32 %v560_v13, %v400_v16  ;;  %v412_v19 = vadd.f32 %v410_v14, %v408_v15 }
  0xfd   : > { %v413_v20 = vadd.f32 %v411_v17, %v409_v18  ;;  %414 = vst.msk [vmem:[%s718_s4] sm:$0xff] %vm392_vm3, %v412_v19 }
  0xff   : > { %415 = vst.msk [vmem:[%s718_s4 + $0x8] sm:$0xff] %vm392_vm3, %v413_v20 }
 0x100 PF: > { %s14_s17 = sadd.s32 1, %s626_s17   ;;  %s719_s15 = smov %s622_s16 }
 0x101   : > { %p11_p7 = scmp.ge.s32.totalorder %s14_s17, 4   ;;  %s720_s16 = smov %s722_s18 }
 0x103   :  { %13 = sbr.rel (!%p11_p7) target bundleno = 2 (0x2), region = 83 }

// kernel: gpt_forward.18
= control target key start
LH: loop header
LB: loop body
LE: loop exit
PB: predicated region body
PF: predicated region fallthrough
CT: control target
= control target key end

     0   :  { %s972_s12 = smov 0   ;;  %s974_s13 = smov 0   ;;  %s1054_s0 = inlined_call_operand.vmem [shape: bf16[6,2,8,16], index: 0, kind: input, shape index: {}, may-alias: {0,1,2}]   ;;  %s1055_s1 = inlined_call_operand.vmem [shape: bf16[6,2,8,16], index: 1, kind: input, shape index: {}, may-alias: {0,1,2}]   ;;  %s1056_s2 = inlined_call_operand.vmem [shape: bf16[6,2,8,16], index: 2, kind: input, shape index: {}, may-alias: {0,1,2}]   ;;  %s1057_s3 = inlined_call_operand.vmem [shape: bf16[2,2,8,16], index: 3, kind: output, shape index: {}]  }
   0x1   :  { %s976_s14 = smov 0   ;;  %s978_s15 = smov 0  }
   0x2   :  { %s980_s16 = smov 0  }
   0x3 LB: > { %s35_s17 = sadd.s32 1, %s938_s14  ;;  %s39_s18 = sadd.s32 1, %s942_s15  ;;  %s946_s16 = sphi %s980_s16, %s13_s16   ;;  %s942_s15 = sphi %s978_s15, %s1061_s15   ;;  %s938_s14 = sphi %s976_s14, %s1060_s14   ;;  %s934_s13 = sphi %s974_s13, %s1059_s13   ;;  %s930_s12 = sphi %s972_s12, %s1058_s12  }
   0x4   : > { %p37_p0 = scmp.ge.s32.totalorder %s35_s17, 2  ;;  %p825_p1 = scmp.ge.s32.totalorder %s946_s16, 1 }
   0x5   : > { %p241_p2 = scmp.lt.s32.totalorder %s946_s16, 5 }
   0x6   : > { %s1063_s17 = smov (%p37_p0, %s35_s17), 0  ;;  %s1065_s18 = smov (!%p37_p0, %s39_s18), %s942_s15 }
   0x7   : > { %p242_p3 = pnand %p825_p1, %p241_p2  ;;  %p41_p4 = scmp.ge.s32.totalorder %s1065_s18, 2 }
   0x8   : > { %p307_p5 = scmp.lt.s32.totalorder (!%p242_p3), %s934_s13, 1  ;;  %s316_s19 = sadd.s32 (!%p242_p3), 2, %s930_s12  ;;  %vm369_vm0 = vcmask (!%p242_p3), 130048   ;;  %v948_v0 = vmov (!%p242_p3), 0.0   ;;  %vm949_vm1 = vmmov (!%p242_p3), 0   ;;  %vm366_vm2 = vcmask (!%p242_p3), 7168  }
   0x9   : > { %s1067_s18 = smov (%p41_p4, %s1065_s18), 0  ;;  %245 = sbr.rel (%p242_p3) target bundleno = 831 (0x33f), region = 32 }
   0xa   : > { %844 = vmatprep.subr.bf16.mxu0 (!%p242_p3), %v948_v0  ;;  %p319_p6 = scmp.lt.s32.totalorder (!%p242_p3), %s316_s19, 5  ;;  %370 = vst.msk [vmem:[#allocation4] sm:$0xff] (!%p242_p3), %vm369_vm0, %v948_v0  ;;  %846 = vmatprep.mubr.msk.bf16.mxu0 (!%p242_p3), %vm949_vm1, %v948_v0  ;;  %p305_p7 = scmp.lt.s32.totalorder (!%p242_p3), %s930_s12, 5  ;;  %v950_v4 = vmov (!%p242_p3), -inf   ;;  %v564_v5 = vlaneseq (!%p242_p3)  ;;  %vm576_vm4 = vcmask (!%p242_p3), 64512   ;;  %v951_v15 = vmov (!%p242_p3), 0  }
   0xb   : > { %850 = vmatprep.subr.bf16.mxu1 (!%p242_p3), %v948_v0  ;;  %852 = vmatprep.mubr.msk.bf16.mxu1 (!%p242_p3), %vm949_vm1, %v948_v0  ;;  %367 = vst.msk [vmem:[#allocation2] sm:$0xff] (!%p242_p3), %vm366_vm2, %v950_v4  ;;  %368 = vst.msk [vmem:[#allocation3] sm:$0xff] (!%p242_p3), %vm366_vm2, %v948_v0  ;;  %s333_s6 = sadd.s32 (!%p242_p3), 4, %s930_s12  ;;  %vm612_vm5 = vcmask (!%p242_p3), 1043456   ;;  %p350_p9 = scmp.lt.s32.totalorder (!%p242_p3), %s930_s12, 1  ;;  %vm672_vm6 = vcmask (!%p242_p3), 125952  }
   0xc   : > { %v565_v6 = vshrl.u32 (!%p242_p3), %v564_v5, 7  ;;  %v570_v7 = vand.u32 (!%p242_p3), 127, %v564_v5  ;;  %900 = vset.pattern.permute.xlu0 (!%p242_p3), %v951_v15  ;;  %901 = vset.pattern.permute.xlu1 (!%p242_p3), %v951_v15  ;;  %p336_p8 = scmp.lt.s32.totalorder (!%p242_p3), %s333_s6, 5 }
   0xe   : > { %vm573_vm3 = vcmp.le.s32.totalorder (!%p242_p3), %v570_v7, %v565_v6 }
  0x10   : > { %s1069_s13 = smov (!%p307_p5, %s934_s13), 1  ;;  %s1071_s19 = smov (!%p319_p6, %s316_s19), 5 }
  0x11   : > { %s306_s20 = scalar_select %p305_p7, %s930_s12, 5  ;;  %v600_v36 = vld [vmem:[#allocation4] sm:$0xff] }
  0x12   : > { %s828_s21 = sshll.u32 %s1071_s19, 1  ;;  %v575_v16 = vld [vmem:[#allocation2] sm:$0xff]  ;;  %s1073_s6 = smov (!%p336_p8, %s333_s6), 5  ;;  %v592_v30 = vld [vmem:[#allocation3] sm:$0xff] }
  0x13   : > { %s327_s22 = sadd.s32 %s828_s21, %s1069_s13  ;;  %s826_s23 = sshll.u32 %s306_s20, 1 }
  0x14   : > { %s829_s24 = sshll.u32 %s327_s22, 2  ;;  %s313_s25 = sadd.s32 %s826_s23, %s1069_s13 }
  0x15   : > { %s329_s28 = scalar_lea.vmem %s1055_s1, %s829_s24  ;;  %s827_s29 = sshll.u32 %s313_s25, 2 }
  0x16   : > { %v514_v1 = vld [vmem:[%s329_s28] sm:$0xf]  ;;  %s315_s5 = scalar_lea.vmem %s1054_s0, %s827_s29  ;;  %s830_s7 = sshll.u32 %s1073_s6, 1 }
  0x17   : > { %v520_v2 = vsel %vm369_vm0, %v514_v1, 0  ;;  %v513_v3 = vld [vmem:[%s315_s5] sm:$0xf]  ;;  %s344_s8 = sadd.s32 %s830_s7, %s1069_s13  ;;  %s1075_s12 = smov (!%p350_p9, %s930_s12), 1 }
  0x18   : > { %845 = vmatpush3.bf16.xpose.msra.mxu0 %v520_v2  ;;  %s831_s9 = sshll.u32 %s344_s8, 2  ;;  %s832_s20 = sshll.u32 %s1075_s12, 1 }
  0x19   : > { %s346_s19 = scalar_lea.vmem %s1056_s2, %s831_s9  ;;  %s358_s21 = sadd.s32 %s832_s20, %s1069_s13 }
  0x1a   : > { %v608_v20 = vld [vmem:[%s346_s19] sm:$0xf]  ;;  %s833_s22 = sshll.u32 %s358_s21, 2 }
  0x1b   : > { %v614_v21 = vsel %vm612_vm5, %v608_v20, 0  ;;  %s360_s25 = scalar_lea.vmem %s1057_s3, %s833_s22 }
  0x1c   : > { %851 = vmatpush3.bf16.msra.mxu1 %v614_v21 }
  0x1f   : > { %847 = vmatmul.mubr.msk.bf16.vlgmr.msra.gmra.mrb[0].mxu0 %vm369_vm0, %v513_v3 }
  0xf2   : > { %v556_v8 = vpop.f32.mrb[0].mxu0 }
  0xf3   : > { %v562_v9 = vmul.f32 0.25, %v556_v8  ;;  %v848_v10 = vpop.f32.mrb[1].mxu0 }
  0xf4   : > { %v559_v11 = vpop.f32.mrb[2].mxu0 }
  0xf5   : > { %v849_v12 = vpop.f32.mrb[3].mxu0  ;;  %v574_v13 = vsel %vm573_vm3, %v562_v9, -1e+30 }
  0xf6   : > { %v577_v14 = vsel %vm576_vm4, %v574_v13, -inf }
  0xf7   : > { %578 = vmax.xlane.f32.xlu0 %v577_v14 }
 0x184   : > { %v579_v17 = vpop.xlane.xlu0 %578 }
 0x185   : > { %v580_v18 = vmax.f32 %v575_v16, %v579_v17 }
 0x187   : > { %v581_v19 = vsub.f32 %v575_v16, %v580_v18  ;;  %658 = vst.msk [vmem:[#allocation2] sm:$0xff] %vm366_vm2, %v580_v18  ;;  %586 = vperm.xlu0 %900, %v580_v18  }
 0x189   : > { %v582_v28 = vmul.f32 1.442695, %v581_v19 }
 0x206   : > { %v587_v22 = vpop.permute.xlu0 %586 }
 0x207   : > { %v589_v23 = vsub.f32 %v574_v13, %v587_v22 }
 0x209   : > { %v590_v24 = vmul.f32 1.442695, %v589_v23 }
 0x20b   : > { %902 = vpow2.f32 %v590_v24 }
 0x20c   : > { %904 = vpow2.f32 %v582_v28 }
 0x215   : > { %v903_v25 = vpop.eup %902 }
 0x216   : > { %v594_v26 = vsel %vm576_vm4, %v903_v25, 0.0  ;;  %v607_v27 = vpack.c.bf16 %v903_v25, %v903_v25  ;;  %v905_v29 = vpop.eup %904 }
 0x217   : > { %595 = vadd.xlane.f32.xlu1 %v594_v26  ;;  %v593_v31 = vmul.f32 %v905_v29, %v592_v30 }
 0x218   : > { %853 = vmatmul.mubr.msk.bf16.vlgmr.msra.gmra.mrb[0].mxu1 %vm576_vm4, %v607_v27 }
 0x228   : > { %603 = vperm.xlu1 %901, %v905_v29  }
 0x2a4   : > { %v596_v32 = vpop.xlane.xlu1 %595 }
 0x2a5   : > { %v597_v33 = vadd.f32 %v596_v32, %v593_v31 }
 0x2a7   : > { %599 = vst.msk [vmem:[#allocation3] sm:$0xff] %vm366_vm2, %v597_v33 }
 0x2a8   : > { %v604_v37 = vpop.permute.xlu1 %603 }
 0x2a9   : > { %v606_v38 = vmul.f32 %v604_v37, %v600_v36 }
 0x2ae   : > { %v662_v34 = vld [vmem:[#allocation3] sm:$0xff] }
 0x2af   : > { %906 = vrcp.f32 %v662_v34 }
 0x2b9   : > { %v907_v35 = vpop.eup %906 }
 0x2ba   : > { %667 = vperm.xlu1 %901, %v907_v35  }
 0x2eb   : > { %v650_v39 = vpop.f32.mrb[0].mxu1 }
 0x2ec   : > { %v656_v40 = vadd.f32 %v650_v39, %v606_v38  ;;  %v854_v41 = vpop.f32.mrb[1].mxu1 }
 0x2ed   : > { %v653_v42 = vpop.f32.mrb[2].mxu1 }
 0x2ee   : > { %657 = vst.msk [vmem:[#allocation4] sm:$0xff] %vm369_vm0, %v656_v40  ;;  %v855_v43 = vpop.f32.mrb[3].mxu1 }
 0x2f5   : > { %v664_v44 = vld [vmem:[#allocation4] sm:$0xff] }
 0x339   : > { %v668_v45 = vpop.permute.xlu1 %667 }
 0x33a   : > { %v670_v46 = vmul.f32 %v668_v45, %v664_v44 }
 0x33c   : > { %v671_v47 = vpack.c.bf16 %v670_v46, %v670_v46 }
 0x33e   : > { %673 = vst.msk [vmem:[%s360_s25] sm:$0xf] %vm672_vm6, %v671_v47 }
 0x33f PF: > { %s13_s16 = sadd.s32 1, %s946_s16   ;;  %s1058_s12 = smov %s938_s14 }
 0x340   : > { %p10_p10 = scmp.ge.s32.totalorder %s13_s16, 6   ;;  %s1059_s13 = smov %s942_s15 }
 0x341   : > { %s1060_s14 = smov %s1063_s17  ;;  %s1061_s15 = smov %s1067_s18 }
 0x342   :  { %12 = sbr.rel (!%p10_p10) target bundleno = 3 (0x3), region = 84 }

// kernel: gpt_forward.31
= control target key start
LH: loop header
LB: loop body
LE: loop exit
PB: predicated region body
PF: predicated region fallthrough
CT: control target
= control target key end

     0   :  { %v163_v1 = vmov 0.0   ;;  %vm164_vm0 = vmmov 0   ;;  %s204_s0 = inlined_call_operand.vmem [shape: bf16[16,32], index: 0, kind: input, shape index: {}]   ;;  %s205_s1 = inlined_call_operand.vmem [shape: bf16[32,128], index: 1, kind: input, shape index: {}]   ;;  %s206_s2 = inlined_call_operand.hbm [shape: f32[16,128], index: 2, kind: output, shape index: {}]  }
   0x1   :  { %v136_v0 = vld [vmem:[%s205_s1] sm:$0xff]   ;;  %123 = vmatprep.subr.bf16.mxu0 %v163_v1  ;;  %v137_v2 = vld [vmem:[%s205_s1 + $0x8] sm:$0xff]   ;;  %127 = vmatprep.mubr.msk.bf16.mxu0 %vm164_vm0, %v163_v1 }
   0x2   :  { %124 = vmatpush3.bf16.msra.mxu0 %v136_v0 }
   0x3   :  { %125 = vmatprep.subr.bf16.mxu0 %v163_v1 }
   0x4   :  { %7 = vsyncpa [#allocation4], 0  ;;  %v138_v3 = vld [vmem:[%s204_s0] sm:$0xff]   ;;  %vm44_vm1 = vcmask 261120   ;;  %s165_s15 = smov [#allocation3]  }
   0x5   :  { %s105_s16 = sshll.u32 %s165_s15, 4  ;;  %s106_s16 = int_to_ptr.vmem [resolvable:$true] %s105_s16 }
   0x6   :  { %126 = vmatpush3.bf16.msra.mxu0 %v137_v2  ;;  %s139_s1 = scalar_lea.vmem %s106_s16, 256  ;;  %p144_p1 = scmp.lt.s32.totalorder %s106_s16, %s106_s16 }
   0x7   :  { %p140_p0 = scmp.ne.s32.totalorder %s106_s16, %s139_s1  ;;  %p145_p2 = scmp.lt.s32.totalorder %s139_s1, %s139_s1 }
   0x9   :  { %128 = vmatmul.mubr.msk.bf16.vlgmr.msra.gmra.mrb[0].mxu0 %vm44_vm1, %v138_v3  ;;  %p146_p3 = por %p145_p2, %p144_p1 }
   0xb   :  { %p147_p4 = pnand %p146_p3, %p140_p0 }
  0xdc   :  { %v82_v4 = vpop.f32.mrb[0].mxu0 }
  0xdd   :  { %98 = vst [vmem:[#allocation3] sm:$0xff] %v82_v4  ;;  %v129_v5 = vpop.f32.mrb[1].mxu0 }
  0xde   :  { %v85_v6 = vpop.f32.mrb[2].mxu0 }
  0xdf   :  { %99 = vst [vmem:[#allocation3 + $0x8] sm:$0xff] %v85_v6  ;;  %v130_v7 = vpop.f32.mrb[3].mxu0 }
  0xe0   :  { %150 = shalt.err (!%p147_p4)
}
  0xe1   :  { %s151_s18 = scalar_lea.hbm %s206_s2, 256 }
  0xe2   :  { %p152_p5 = scmp.ne.s32.totalorder %s206_s2, %s151_s18  ;;  %p155_p6 = scmp.lt.u32.totalorder %s151_s18, %s206_s2 }
  0xe4   :  { %p157_p7 = pnand %p155_p6, %p152_p5 }
  0xe6   :  { %160 = shalt.err (!%p157_p7)
}
  0xe7   :  { %s166_s23 = smov 128   ;;  %s167_s24 = smov 8  }
  0xe8   :  { %111 = dma.vmem_to_hbm [thread:$0]  %s106_s16, 256, %s206_s2, [#allocation4], %s166_s23, %s166_s23, %s167_s24  }
  0xe9   :  { %161 = dma.done.wait [#allocation4], 256  }
  0xea   :  { %162 = vsyncadd [#allocation4], 4294967040 }
  0xeb   :  { %115 = vsyncpa [#allocation4], 1 }

// kernel: gpt_forward.21
= control target key start
LH: loop header
LB: loop body
LE: loop exit
PB: predicated region body
PF: predicated region fallthrough
CT: control target
= control target key end

     0   :  { %v175_v0 = vmov 0.0   ;;  %vm176_vm0 = vmmov 0   ;;  %vm46_vm1 = vcmask 261120   ;;  %s212_s1 = inlined_call_operand.vmem [shape: bf16[32,128], index: 1, kind: input, shape index: {}]   ;;  %s213_s0 = inlined_call_operand.vmem [shape: bf16[16,32], index: 0, kind: input, shape index: {}]   ;;  %s214_s2 = inlined_call_operand.vmem [shape: f32[1,128], index: 2, kind: input, shape index: {}]   ;;  %s215_s3 = inlined_call_operand.vmem [shape: bf16[16,128], index: 3, kind: output, shape index: {}]  }
   0x1   :  { %158 = vmatprep.subr.bf16.mxu0 %v175_v0  ;;  %v168_v1 = vld [vmem:[%s212_s1] sm:$0xff]   ;;  %162 = vmatprep.mubr.msk.bf16.mxu0 %vm176_vm0, %v175_v0  ;;  %v169_v2 = vld [vmem:[%s212_s1 + $0x8] sm:$0xff]  }
   0x2   :  { %159 = vmatpush3.bf16.msra.mxu0 %v168_v1  ;;  %v170_v3 = vld [vmem:[%s213_s0] sm:$0xff]  }
   0x3   :  { %160 = vmatprep.subr.bf16.mxu0 %v175_v0  ;;  %v145_v4 = vld [vmem:[%s214_s2] ss:$0 sm:$0xff] }
   0x6   :  { %161 = vmatpush3.bf16.msra.mxu0 %v169_v2 }
   0x9   :  { %163 = vmatmul.mubr.msk.bf16.vlgmr.msra.gmra.mrb[0].mxu0 %vm46_vm1, %v170_v3 }
  0xdc   :  { %v84_v5 = vpop.f32.mrb[0].mxu0 }
  0xdd   :  { %v107_v6 = vadd.f32 %v145_v4, %v84_v5  ;;  %v164_v7 = vpop.f32.mrb[1].mxu0 }
  0xde   :  { %v87_v8 = vpop.f32.mrb[2].mxu0 }
  0xdf   :  { %v111_v9 = vmul.f32 0.044715, %v107_v6  ;;  %v108_v10 = vadd.f32 %v145_v4, %v87_v8  ;;  %v165_v11 = vpop.f32.mrb[3].mxu0  ;;  %v109_v24 = vmul.f32 0.5, %v107_v6 }
  0xe1   :  { %v113_v12 = vmul.f32 %v111_v9, %v107_v6  ;;  %v112_v13 = vmul.f32 0.044715, %v108_v10  ;;  %v110_v25 = vmul.f32 0.5, %v108_v10 }
  0xe3   :  { %v115_v14 = vmul.f32 %v113_v12, %v107_v6  ;;  %v114_v15 = vmul.f32 %v112_v13, %v108_v10 }
  0xe5   :  { %v117_v16 = vadd.f32 %v115_v14, %v107_v6  ;;  %v116_v17 = vmul.f32 %v114_v15, %v108_v10 }
  0xe7   :  { %v119_v18 = vmul.f32 0.7978846, %v117_v16  ;;  %v118_v19 = vadd.f32 %v116_v17, %v108_v10 }
  0xe9   :  { %171 = vtanh.f32 %v119_v18  ;;  %v120_v20 = vmul.f32 0.7978846, %v118_v19 }
  0xeb   :  { %173 = vtanh.f32 %v120_v20 }
  0xf3   :  { %v172_v21 = vpop.eup %171 }
  0xf4   :  { %v123_v22 = vadd.f32 1.0, %v172_v21 }
  0xf5   :  { %v174_v23 = vpop.eup %173 }
  0xf6   :  { %v124_v26 = vadd.f32 1.0, %v174_v23  ;;  %v125_v27 = vmul.f32 %v123_v22, %v109_v24 }
  0xf8   :  { %v126_v28 = vmul.f32 %v124_v26, %v110_v25 }
  0xfa   :  { %v153_v29 = vpack.c.bf16 %v126_v28, %v125_v27 }
  0xfc   :  { %154 = vst [vmem:[%s215_s3] sm:$0xff] %v153_v29  }

// kernel: gpt_forward.22
= control target key start
LH: loop header
LB: loop body
LE: loop exit
PB: predicated region body
PF: predicated region fallthrough
CT: control target
= control target key end

     0   :  { %vm22_vm0 = vcmask 261120   ;;  %v219_v0 = vmov 0.0   ;;  %vm220_vm1 = vmmov 0   ;;  %s294_s1 = inlined_call_operand.vmem [shape: bf16[128,32], index: 1, kind: input, shape index: {}]   ;;  %s295_s0 = inlined_call_operand.vmem [shape: bf16[16,128], index: 0, kind: input, shape index: {}]   ;;  %s296_s2 = inlined_call_operand.vmem [shape: f32[1,32], index: 2, kind: input, shape index: {}]   ;;  %s297_s3 = inlined_call_operand.vmem [shape: f32[16,32], index: 3, kind: input, shape index: {}]   ;;  %s298_s4 = inlined_call_operand.vmem [shape: f32[16,32], index: 4, kind: output, shape index: {}]  }
   0x1   :  { %188 = vmatprep.subr.bf16.mxu0 %v219_v0  ;;  %v210_v1 = vld [vmem:[%s294_s1] sm:$0xff]   ;;  %204 = vmatprep.mubr.msk.bf16.mxu0 %vm220_vm1, %v219_v0  ;;  %23 = vst.msk [vmem:[#allocation2] sm:$0xff] %vm22_vm0, %v219_v0  ;;  %24 = vst.msk [vmem:[#allocation2 + $0x8] sm:$0xff] %vm22_vm0, %v219_v0  ;;  %v211_v2 = vld [vmem:[%s294_s1 + $0x8] sm:$0xff]  }
   0x2   :  { %189 = vmatpush3.bf16.msra.mxu0 %v210_v1  ;;  %v212_v3 = vld [vmem:[%s294_s1 + $0x10] sm:$0xff]   ;;  %v213_v4 = vld [vmem:[%s294_s1 + $0x18] sm:$0xff]   ;;  %v214_v5 = vld [vmem:[%s294_s1 + $0x20] sm:$0xff]  }
   0x3   :  { %190 = vmatprep.subr.bf16.mxu0 %v219_v0  ;;  %v215_v6 = vld [vmem:[%s294_s1 + $0x28] sm:$0xff]   ;;  %v216_v7 = vld [vmem:[%s294_s1 + $0x30] sm:$0xff]   ;;  %v217_v8 = vld [vmem:[%s294_s1 + $0x38] sm:$0xff]  }
   0x4   :  { %v218_v9 = vld [vmem:[%s295_s0] sm:$0xff]   ;;  %v160_v22 = vld [vmem:[%s297_s3 + $0x8] sm:$0xff] }
   0x5   :  { %v178_v18 = vld [vmem:[%s296_s2] ss:$0 sm:$0xff] }
   0x6   :  { %191 = vmatpush3.bf16.msra.mxu0 %v211_v2  ;;  %v159_v20 = vld [vmem:[%s297_s3] sm:$0xff] }
   0x7   :  { %192 = vmatprep.subr.bf16.mxu0 %v219_v0 }
   0x8   :  { %v25_v10 = vld [vmem:[#allocation2] sm:$0xff]  ;;  %v26_v12 = vld [vmem:[#allocation2 + $0x8] sm:$0xff] }
   0xa   :  { %193 = vmatpush3.bf16.msra.mxu0 %v212_v3 }
   0xb   :  { %194 = vmatprep.subr.bf16.mxu0 %v219_v0 }
   0xe   :  { %195 = vmatpush3.bf16.msra.mxu0 %v213_v4 }
   0xf   :  { %196 = vmatprep.subr.bf16.mxu0 %v219_v0 }
  0x12   :  { %197 = vmatpush3.bf16.msra.mxu0 %v214_v5 }
  0x13   :  { %198 = vmatprep.subr.bf16.mxu0 %v219_v0 }
  0x16   :  { %199 = vmatpush3.bf16.msra.mxu0 %v215_v6 }
  0x17   :  { %200 = vmatprep.subr.bf16.mxu0 %v219_v0 }
  0x1a   :  { %201 = vmatpush3.bf16.msra.mxu0 %v216_v7 }
  0x1b   :  { %202 = vmatprep.subr.bf16.mxu0 %v219_v0 }
  0x1e   :  { %203 = vmatpush3.bf16.msra.mxu0 %v217_v8 }
  0x21   :  { %205 = vmatmul.mubr.bf16.vlgmr.msra.gmra.mrb[0].mxu0 %v218_v9 }
  0xf4   :  { %v133_v11 = vpop.f32.mrb[0].mxu0 }
  0xf5   :  { %v140_v13 = vadd.f32 %v133_v11, %v25_v10  ;;  %v206_v14 = vpop.f32.mrb[1].mxu0 }
  0xf6   :  { %v136_v15 = vpop.f32.mrb[2].mxu0 }
  0xf7   :  { %143 = vst.msk [vmem:[#allocation2] sm:$0xff] %vm22_vm0, %v140_v13  ;;  %v141_v16 = vadd.f32 %v136_v15, %v26_v12  ;;  %v207_v17 = vpop.f32.mrb[3].mxu0 }
  0xf9   :  { %144 = vst.msk [vmem:[#allocation2 + $0x8] sm:$0xff] %vm22_vm0, %v141_v16 }
  0xfe   :  { %v148_v19 = vld [vmem:[#allocation2] sm:$0xff] }
  0xff   :  { %v157_v21 = vadd.f32 %v178_v18, %v148_v19 }
 0x100   :  { %v149_v23 = vld [vmem:[#allocation2 + $0x8] sm:$0xff] }
 0x101   :  { %v161_v24 = vadd.f32 %v159_v20, %v157_v21  ;;  %v158_v25 = vadd.f32 %v178_v18, %v149_v23 }
 0x103   :  { %163 = vst.msk [vmem:[%s298_s4] sm:$0xff] %vm22_vm0, %v161_v24  ;;  %v162_v26 = vadd.f32 %v160_v22, %v158_v25 }
 0x105   :  { %164 = vst.msk [vmem:[%s298_s4 + $0x8] sm:$0xff] %vm22_vm0, %v162_v26 }

</bundles_post_ra>
